<compile_context>
chip_gen: v5e
topology: v5e:2x2
jax: 0.10.0
libtpu: 0.0.40
codegen_flags: <defaults>
</compile_context>

<pallas_src>
import jax
import jax.numpy as jnp
from jax.experimental import pallas as pl
from jax.experimental.pallas import tpu as pltpu

# Small demo dims (real module defaults are L=512, D=128, K=1, PATCH=128).
L = 128           # bag-level feature dim
D = 32            # attention hidden dim
K = 1             # attention heads (classifier flatten assumes K == 1)
NUM_CLASSES = 1
PATCH = 16        # ImagePatcher patch_size (shrunk for the demo)

assert K == 1, "classifier Linear(L*K, C) flatten only reproduced for K == 1"

# ---- tiling / VMEM budget -----------------------------------------------------
# Per-generation production guidance (raise vmem_limit_bytes accordingly):
#   v5e: TM=128 (4x128x128 MXU), TK=2048          (16 MiB default scoped VMEM)
#   v6e: TM=256, TK=2048-4096                     (32 MiB scoped / 128 MiB phys)
#   v7x: TM=256, TK=2048, leave headroom          (64 MiB physical VMEM)
# Demo values below are clamped to the problem size by _select_tiles().
TM_MAX = 256
TK_MAX = 256       # production: 2048-4096 (multiple of 256)
VMEM_LIMIT_BYTES = 32 * 1024 * 1024

_IMAGENET_MEAN = jnp.array([0.485, 0.456, 0.406], jnp.float32)
_IMAGENET_STD = jnp.array([0.229, 0.224, 0.225], jnp.float32)


def _round_up(a, m):
    return pl.cdiv(a, m) * m


def _select_tiles(n, feat_in):
    tm = TM_MAX if n >= TM_MAX else _round_up(n, 8)
    tk = TK_MAX if feat_in >= TK_MAX else _round_up(feat_in, 128)
    return tm, tk


# ------------------------- call 1: feature matmul ------------------------------

def _feat_kernel(x_ref, wf_ref, bf_ref, h_ref, acc_ref):
    k = pl.program_id(1)
    nk = pl.num_programs(1)

    @pl.when(k == 0)
    def _():
        acc_ref[...] = jnp.zeros_like(acc_ref)

    # cast the raw f32 pixel tile to bf16 in-kernel (no wrapper-side HBM cast pass)
    acc_ref[...] += jnp.dot(x_ref[...].astype(jnp.bfloat16), wf_ref[...],
                            preferred_element_type=jnp.float32)

    @pl.when(k == nk - 1)
    def _():
        h_ref[...] = (acc_ref[...] + bf_ref[...]).astype(h_ref.dtype)


# ------------------------- call 2: gated MIL head ------------------------------

def _make_head_kernel(n_actual, n_pad):
    def head_kernel(h_ref, wvu_ref, bvu_ref, wwt_ref, bw_ref, wc_ref, bc_ref,
                    y_ref, a_ref):
        h = h_ref[...]                                     # (Npad, L) f32
        hb = h.astype(jnp.bfloat16)
        # fused A_V | A_U gating: single (L, 2D) bf16 matmul, split halves
        gate = jnp.dot(hb, wvu_ref[...],
                       preferred_element_type=jnp.float32) + bvu_ref[...]
        av = jnp.tanh(gate[:, :D])
        au = jax.nn.sigmoid(gate[:, D:])
        gated = (av * au).astype(jnp.bfloat16)            # (Npad, D)
        # attention logits, lane-dense (K, Npad): ww^T @ gated^T (NT dot, bf16)
        logits = jax.lax.dot_general(
            wwt_ref[...], gated, (((1,), (1,)), ((), ())),
            preferred_element_type=jnp.float32) + bw_ref[...]
        # Mask padded instances (padded H rows equal the bias row, their softmax
        # weight must be forced to zero).  n_actual >= 1 is asserted in the
        # wrapper, so the softmax denominator is never all-masked (no NaN).
        if n_actual < n_pad:
            col = jax.lax.broadcasted_iota(jnp.int32, logits.shape, 1)
            logits = jnp.where(col < n_actual, logits, -1e30)
        mx = jnp.max(logits, axis=1, keepdims=True)
        ex = jnp.exp(logits - mx)
        denom = jnp.sum(ex, axis=1, keepdims=True)
        a_sm = ex * pl.reciprocal(denom, approx=True)      # (K, Npad) f32
        a_ref[...] = a_sm
        # bag pooling and classifier in f32 (tiny; keeps attention precision)
        m = jnp.dot(a_sm, h, preferred_element_type=jnp.float32)      # (K, L)
        y_ref[...] = jnp.dot(m, wc_ref[...],
                             preferred_element_type=jnp.float32) + bc_ref[...]
    return head_kernel


# ------------------------------ wrappers ---------------------------------------

def gated_attention_mil_forward(x, kp):
    """x: (1, C, H, W) float32 NCHW image, like the PyTorch module."""
    _, c, h, w = x.shape
    nh, nw = h // PATCH, w // PATCH
    n = nh * nw
    assert n >= 1, "empty bag: instance softmax undefined"
    feat_in = c * PATCH * PATCH

    tm, tk = _select_tiles(n, feat_in)
    n_pad = _round_up(n, tm)
    k_pad = _round_up(feat_in, tk)

    # ImagePatcher.convert_img_to_bag: non-overlapping tiles, channel-major flatten.
    patches = x[0].reshape(c, nh, PATCH, nw, PATCH).transpose(1, 3, 0, 2, 4)
    flat = patches.reshape(n, feat_in)
    flat = jnp.pad(flat, ((0, n_pad - n), (0, k_pad - feat_in)))  # no-op when exact

    w_feat = kp['w_feat']
    if w_feat.shape[0] != k_pad:
        w_feat = jnp.pad(w_feat, ((0, k_pad - w_feat.shape[0]), (0, 0)))

    grid = (n_pad // tm, k_pad // tk)

    # Call 1: H = flat @ w_feat + b.  Instance axis "parallel" (v7x megacore),
    # contraction axis "arbitrary" (f32 accumulator carried across it).
    # NOTE: w_feat blocks are re-fetched once per instance tile; with TM=128/256
    # the number of instance tiles is small. A weight-stationary (k-outer,
    # persistent full-H accumulator) variant trades that for per-step H writes.
    H = pl.pallas_call(
        _feat_kernel,
        out_shape=jax.ShapeDtypeStruct((n_pad, L), jnp.float32),
        grid_spec=pltpu.PrefetchScalarGridSpec(
            num_scalar_prefetch=0,
            grid=grid,
            in_specs=[
                pl.BlockSpec((tm, tk), lambda i, k: (i, k)),   # raw f32 pixels
                pl.BlockSpec((tk, L), lambda i, k: (k, 0)),    # folded w_feat (bf16)
                pl.BlockSpec((1, L), lambda i, k: (0, 0)),     # folded bias (f32)
            ],
            out_specs=pl.BlockSpec((tm, L), lambda i, k: (i, 0)),
            scratch_shapes=[pltpu.VMEM((tm, L), jnp.float32)],
        ),
        compiler_params=pltpu.CompilerParams(
            dimension_semantics=("parallel", "arbitrary"),
            vmem_limit_bytes=VMEM_LIMIT_BYTES),
    )(flat, w_feat, kp['b_feat'])

    # Call 2: gated-attention MIL head on the full H.
    head_kernel = _make_head_kernel(n, n_pad)
    y, a = pl.pallas_call(
        head_kernel,
        out_shape=(jax.ShapeDtypeStruct((K, NUM_CLASSES), jnp.float32),
                   jax.ShapeDtypeStruct((K, n_pad), jnp.float32)),
        grid_spec=pltpu.PrefetchScalarGridSpec(
            num_scalar_prefetch=0,
            grid=(1,),
            in_specs=[
                pl.BlockSpec((n_pad, L), lambda i: (0, 0)),          # H (f32)
                pl.BlockSpec((L, 2 * D), lambda i: (0, 0)),          # fused Wv|Wu (bf16)
                pl.BlockSpec((1, 2 * D), lambda i: (0, 0)),          # fused bv|bu (f32)
                pl.BlockSpec((K, D), lambda i: (0, 0)),              # ww^T (bf16)
                pl.BlockSpec((K, 1), lambda i: (0, 0)),              # bw (f32)
                pl.BlockSpec((L * K, NUM_CLASSES), lambda i: (0, 0)),  # wc (f32)
                pl.BlockSpec((1, NUM_CLASSES), lambda i: (0, 0)),      # bc (f32)
            ],
            out_specs=(pl.BlockSpec((K, NUM_CLASSES), lambda i: (0, 0)),
                       pl.BlockSpec((K, n_pad), lambda i: (0, 0))),
        ),
        compiler_params=pltpu.CompilerParams(
            dimension_semantics=("arbitrary",),
            vmem_limit_bytes=VMEM_LIMIT_BYTES),
    )(H, kp['wvu'], kp['bvu'], kp['ww_t'], kp['bw'], kp['wc'], kp['bc'])

    Y = y.reshape(1, K, NUM_CLASSES)            # (bs, K, num_classes)
    A = a[:, :n].reshape(1, K, n)               # (bs, K, num_instances), softmaxed
    return Y, A


def init_params(key):
    """Raw parameters mirroring the PyTorch module layout (all f32)."""
    feat_in = 3 * PATCH * PATCH
    ks = jax.random.split(key, 5)
    return {
        'w_feat': 0.02 * jax.random.normal(ks[0], (feat_in, L), jnp.float32),
        'b_feat': jnp.zeros((1, L), jnp.float32),
        'wv': 0.1 * jax.random.normal(ks[1], (L, D), jnp.float32),
        'bv': jnp.zeros((1, D), jnp.float32),
        'wu': 0.1 * jax.random.normal(ks[2], (L, D), jnp.float32),
        'bu': jnp.zeros((1, D), jnp.float32),
        'ww': 0.1 * jax.random.normal(ks[3], (D, K), jnp.float32),
        'bw': jnp.zeros((1, K), jnp.float32),
        'wc': 0.1 * jax.random.normal(ks[4], (L * K, NUM_CLASSES), jnp.float32),
        'bc': jnp.zeros((1, NUM_CLASSES), jnp.float32),
    }


def prepare_kernel_params(p):
    """One-time prep: fold ImageNet norm into w_feat/b_feat, fuse Wv/Wu,
    pre-transpose ww to (K, D), cast large matmul weights to bf16 (biases,
    pooling and classifier weights stay f32)."""
    feat_in = p['w_feat'].shape[0]
    ppx = feat_in // 3                                   # pixels per channel
    mean = jnp.repeat(_IMAGENET_MEAN, ppx)[:, None]      # (feat_in, 1)
    std = jnp.repeat(_IMAGENET_STD, ppx)[:, None]
    w_fold = p['w_feat'] / std
    b_fold = p['b_feat'] - (mean / std * p['w_feat']).sum(axis=0, keepdims=True)

    return {
        'w_feat': w_fold.astype(jnp.bfloat16),                         # (feat_in, L)
        'b_feat': b_fold,                                              # (1, L) f32
        'wvu': jnp.concatenate([p['wv'], p['wu']], axis=1).astype(jnp.bfloat16),
        'bvu': jnp.concatenate([p['bv'], p['bu']], axis=1),            # (1, 2D) f32
        'ww_t': p['ww'].T.astype(jnp.bfloat16),                        # (K, D) bf16
        'bw': p['bw'].T,                                               # (K, 1) f32
        'wc': p['wc'],                                                 # (L*K, C) f32
        'bc': p['bc'],                                                 # (1, C) f32
    }


def reference_forward(x, p):
    """Pure-JAX f32 reference (un-folded, un-fused) of the same forward."""
    _, c, h, w = x.shape
    nh, nw = h // PATCH, w // PATCH
    patches = x[0].reshape(c, nh, PATCH, nw, PATCH).transpose(1, 3, 0, 2, 4)
    patches = patches.reshape(nh * nw, c, PATCH, PATCH)
    patches = (patches - _IMAGENET_MEAN.reshape(1, 3, 1, 1)) \
        / _IMAGENET_STD.reshape(1, 3, 1, 1)
    flat = patches.reshape(nh * nw, -1)
    H = flat @ p['w_feat'] + p['b_feat']
    av = jnp.tanh(H @ p['wv'] + p['bv'])
    au = jax.nn.sigmoid(H @ p['wu'] + p['bu'])
    logits = (av * au) @ p['ww'] + p['bw']              # (N, K)
    a = jax.nn.softmax(logits.T, axis=1)                # (K, N)
    m = a @ H                                           # (K, L)
    y = m @ p['wc'] + p['bc']
    return y.reshape(1, K, NUM_CLASSES), a.reshape(1, K, nh * nw)


if __name__ == "__main__":
    key = jax.random.PRNGKey(0)
    k_x, k_p = jax.random.split(key)
    # Small NCHW image: 64x128 -> 4x8 = 32 patches of 16x16 (feat_in = 768).
    x = jax.random.uniform(k_x, (1, 3, 64, 128), jnp.float32)
    raw_params = init_params(k_p)
    kparams = prepare_kernel_params(raw_params)

    Y, A = jax.jit(gated_attention_mil_forward)(x, kparams)
    Y = jax.block_until_ready(Y)
    A = jax.block_until_ready(A)

    assert Y.shape == (1, K, NUM_CLASSES)
    assert A.shape == (1, K, 32)
    # approx reciprocal in the softmax -> loose tolerance on the sum
    assert jnp.allclose(jnp.sum(A), float(K), atol=1e-2)

    # numerical sanity vs. pure-JAX f32 reference (bf16 matmuls -> loose tol)
    Y_ref, A_ref = reference_forward(x, raw_params)
    assert jnp.allclose(Y, Y_ref, atol=5e-2, rtol=5e-2)
    assert jnp.allclose(A, A_ref, atol=5e-2)

    print("KERNEL_OK")
</pallas_src>

<mosaic_0001>
module attributes {stable_mosaic.version = 11 : i64} {
  func.func @_feat_kernel(%arg0: i32, %arg1: i32, %arg2: memref<32x256xf32, #tpu.memory_space<vmem>>, %arg3: memref<256x128xbf16, #tpu.memory_space<vmem>>, %arg4: memref<1x128xf32, #tpu.memory_space<vmem>>, %arg5: memref<32x128xf32, #tpu.memory_space<vmem>>, %arg6: memref<32x128xf32, #tpu.memory_space<vmem>>) attributes {dimension_semantics = [#tpu.dimension_semantics<parallel>, #tpu.dimension_semantics<arbitrary>], iteration_bounds = array<i64: 1, 3>, scalar_prefetch = 0 : i64, scratch_operands = 1 : i64, tpu.core_type = #tpu.core_type<tc>, window_params = [{transform_indices = @transform_0, window_bounds = array<i64: 32, 256>}, {transform_indices = @transform_1, window_bounds = array<i64: 256, 128>}, {pipeline_mode = #tpu.pipeline_mode<synchronous>, transform_indices = @transform_2, window_bounds = array<i64: 1, 128>}, {transform_indices = @transform_3, window_bounds = array<i64: 32, 128>}]} {
    %c0_i32 = arith.constant 0 : i32
    %0 = arith.cmpi eq, %arg1, %c0_i32 : i32
    %1 = arith.extui %0 : i1 to i32
    %c0_i32_0 = arith.constant 0 : i32
    %2 = arith.cmpi ne, %1, %c0_i32_0 : i32
    scf.if %2 {
      %cst_9 = arith.constant 0.000000e+00 : f32
      %13 = vector.broadcast %cst_9 : f32 to vector<32x128xf32>
      %c0_10 = arith.constant 0 : index
      %c0_11 = arith.constant 0 : index
      %14 = vector.load %arg6[%c0_10, %c0_11] : memref<32x128xf32, #tpu.memory_space<vmem>>, vector<32x128xf32>
      tpu.vector_store %arg6[%c0_10, %c0_11], %13 {strides = array<i32>} : memref<32x128xf32, #tpu.memory_space<vmem>>, vector<32x128xf32>,
    } else {
    }
    %c0 = arith.constant 0 : index
    %c0_1 = arith.constant 0 : index
    %3 = vector.load %arg6[%c0, %c0_1] : memref<32x128xf32, #tpu.memory_space<vmem>>, vector<32x128xf32>
    %c0_2 = arith.constant 0 : index
    %c0_3 = arith.constant 0 : index
    %4 = vector.load %arg2[%c0_2, %c0_3] : memref<32x256xf32, #tpu.memory_space<vmem>>, vector<32x256xf32>
    %5 = arith.truncf %4 : vector<32x256xf32> to vector<32x256xbf16>
    %c0_4 = arith.constant 0 : index
    %c0_5 = arith.constant 0 : index
    %6 = vector.load %arg3[%c0_4, %c0_5] : memref<256x128xbf16, #tpu.memory_space<vmem>>, vector<256x128xbf16>
    %cst = arith.constant dense<0.000000e+00> : vector<32x128xf32>
    %7 = tpu.matmul %5, %6, %cst {dimension_numbers = #tpu.dot_dimension_numbers<[1], [0], [0], [1], [0, 0, 1, 1], [], []>} : vector<32x256xbf16>, vector<256x128xbf16>, vector<32x128xf32> -> vector<32x128xf32>
    %8 = arith.addf %3, %7 : vector<32x128xf32>
    %c0_6 = arith.constant 0 : index
    %c0_7 = arith.constant 0 : index
    %9 = vector.load %arg6[%c0_6, %c0_7] : memref<32x128xf32, #tpu.memory_space<vmem>>, vector<32x128xf32>
    tpu.vector_store %arg6[%c0_6, %c0_7], %8 {strides = array<i32>} : memref<32x128xf32, #tpu.memory_space<vmem>>, vector<32x128xf32>,
    %c2_i32 = arith.constant 2 : i32
    %10 = arith.cmpi eq, %arg1, %c2_i32 : i32
    %11 = arith.extui %10 : i1 to i32
    %c0_i32_8 = arith.constant 0 : i32
    %12 = arith.cmpi ne, %11, %c0_i32_8 : i32
    scf.if %12 {
      %c0_9 = arith.constant 0 : index
      %c0_10 = arith.constant 0 : index
      %13 = vector.load %arg6[%c0_9, %c0_10] : memref<32x128xf32, #tpu.memory_space<vmem>>, vector<32x128xf32>
      %c0_11 = arith.constant 0 : index
      %c0_12 = arith.constant 0 : index
      %14 = vector.load %arg4[%c0_11, %c0_12] : memref<1x128xf32, #tpu.memory_space<vmem>>, vector<1x128xf32>
      %15 = vector.broadcast %14 : vector<1x128xf32> to vector<32x128xf32>
      %16 = arith.addf %13, %15 : vector<32x128xf32>
      %c0_13 = arith.constant 0 : index
      %c0_14 = arith.constant 0 : index
      %17 = vector.load %arg5[%c0_13, %c0_14] : memref<32x128xf32, #tpu.memory_space<vmem>>, vector<32x128xf32>
      tpu.vector_store %arg5[%c0_13, %c0_14], %16 {strides = array<i32>} : memref<32x128xf32, #tpu.memory_space<vmem>>, vector<32x128xf32>,
    } else {
    }
    return
  }
  func.func @transform_0(%arg0: i32, %arg1: i32) -> (i32, i32) {
    %c0_i32 = arith.constant 0 : i32
    return %arg0, %arg1 : i32, i32
  }
  func.func @transform_1(%arg0: i32, %arg1: i32) -> (i32, i32) {
    %c0_i32 = arith.constant 0 : i32
    %c0_i32_0 = arith.constant 0 : i32
    return %arg1, %c0_i32 : i32, i32
  }
  func.func @transform_2(%arg0: i32, %arg1: i32) -> (i32, i32) {
    %c0_i32 = arith.constant 0 : i32
    %c0_i32_0 = arith.constant 0 : i32
    %c0_i32_1 = arith.constant 0 : i32
    return %c0_i32, %c0_i32_0 : i32, i32
  }
  func.func @transform_3(%arg0: i32, %arg1: i32) -> (i32, i32) {
    %c0_i32 = arith.constant 0 : i32
    %c0_i32_0 = arith.constant 0 : i32
    return %arg0, %c0_i32 : i32, i32
  }
}

module attributes {stable_mosaic.version = 11 : i64} {
  func.func @head_kernel(%arg0: i32, %arg1: memref<32x128xf32, #tpu.memory_space<vmem>>, %arg2: memref<128x64xbf16, #tpu.memory_space<vmem>>, %arg3: memref<1x64xf32, #tpu.memory_space<vmem>>, %arg4: memref<1x32xbf16, #tpu.memory_space<vmem>>, %arg5: memref<1x1xf32, #tpu.memory_space<vmem>>, %arg6: memref<128x1xf32, #tpu.memory_space<vmem>>, %arg7: memref<1x1xf32, #tpu.memory_space<vmem>>, %arg8: memref<1x1xf32, #tpu.memory_space<vmem>>, %arg9: memref<1x32xf32, #tpu.memory_space<vmem>>) attributes {dimension_semantics = [#tpu.dimension_semantics<arbitrary>], iteration_bounds = array<i64: 1>, scalar_prefetch = 0 : i64, scratch_operands = 0 : i64, tpu.core_type = #tpu.core_type<tc>, window_params = [{pipeline_mode = #tpu.pipeline_mode<synchronous>, transform_indices = @transform_0, window_bounds = array<i64: 32, 128>}, {pipeline_mode = #tpu.pipeline_mode<synchronous>, transform_indices = @transform_1, window_bounds = array<i64: 128, 64>}, {pipeline_mode = #tpu.pipeline_mode<synchronous>, transform_indices = @transform_2, window_bounds = array<i64: 1, 64>}, {pipeline_mode = #tpu.pipeline_mode<synchronous>, transform_indices = @transform_3, window_bounds = array<i64: 1, 32>}, {pipeline_mode = #tpu.pipeline_mode<synchronous>, transform_indices = @transform_4, window_bounds = array<i64: 1, 1>}, {pipeline_mode = #tpu.pipeline_mode<synchronous>, transform_indices = @transform_5, window_bounds = array<i64: 128, 1>}, {pipeline_mode = #tpu.pipeline_mode<synchronous>, transform_indices = @transform_6, window_bounds = array<i64: 1, 1>}, {pipeline_mode = #tpu.pipeline_mode<synchronous>, transform_indices = @transform_7, window_bounds = array<i64: 1, 1>}, {pipeline_mode = #tpu.pipeline_mode<synchronous>, transform_indices = @transform_8, window_bounds = array<i64: 1, 32>}]} {
    %c0 = arith.constant 0 : index
    %c0_0 = arith.constant 0 : index
    %0 = vector.load %arg1[%c0, %c0_0] : memref<32x128xf32, #tpu.memory_space<vmem>>, vector<32x128xf32>
    %1 = arith.truncf %0 : vector<32x128xf32> to vector<32x128xbf16>
    %c0_1 = arith.constant 0 : index
    %c0_2 = arith.constant 0 : index
    %2 = vector.load %arg2[%c0_1, %c0_2] : memref<128x64xbf16, #tpu.memory_space<vmem>>, vector<128x64xbf16>
    %cst = arith.constant dense<0.000000e+00> : vector<32x64xf32>
    %3 = tpu.matmul %1, %2, %cst {dimension_numbers = #tpu.dot_dimension_numbers<[1], [0], [0], [1], [0, 0, 1, 1], [], []>} : vector<32x128xbf16>, vector<128x64xbf16>, vector<32x64xf32> -> vector<32x64xf32>
    %c0_3 = arith.constant 0 : index
    %c0_4 = arith.constant 0 : index
    %4 = vector.load %arg3[%c0_3, %c0_4] : memref<1x64xf32, #tpu.memory_space<vmem>>, vector<1x64xf32>
    %5 = vector.broadcast %4 : vector<1x64xf32> to vector<32x64xf32>
    %6 = arith.addf %3, %5 : vector<32x64xf32>
    %7 = vector.extract_strided_slice %6 {offsets = [0, 0], sizes = [32, 32], strides = [1, 1]} : vector<32x64xf32> to vector<32x32xf32>
    %8 = math.tanh %7 : vector<32x32xf32>
    %9 = vector.extract_strided_slice %6 {offsets = [0, 32], sizes = [32, 32], strides = [1, 1]} : vector<32x64xf32> to vector<32x32xf32>
    %10 = arith.negf %9 : vector<32x32xf32>
    %11 = math.exp %10 : vector<32x32xf32>
    %cst_5 = arith.constant 1.000000e+00 : f32
    %12 = vector.broadcast %cst_5 : f32 to vector<32x32xf32>
    %13 = arith.addf %12, %11 : vector<32x32xf32>
    %14 = arith.divf %12, %13 : vector<32x32xf32>
    %15 = arith.mulf %8, %14 : vector<32x32xf32>
    %16 = arith.truncf %15 : vector<32x32xf32> to vector<32x32xbf16>
    %c0_6 = arith.constant 0 : index
    %c0_7 = arith.constant 0 : index
    %17 = vector.load %arg4[%c0_6, %c0_7] : memref<1x32xbf16, #tpu.memory_space<vmem>>, vector<1x32xbf16>
    %cst_8 = arith.constant dense<0.000000e+00> : vector<1x32xf32>
    %18 = tpu.matmul %17, %16, %cst_8 {dimension_numbers = #tpu.dot_dimension_numbers<[1], [1], [0], [0], [0, 0, 1, 0], [], []>} : vector<1x32xbf16>, vector<32x32xbf16>, vector<1x32xf32> -> vector<1x32xf32>
    %c0_9 = arith.constant 0 : index
    %c0_10 = arith.constant 0 : index
    %19 = vector.load %arg5[%c0_9, %c0_10] : memref<1x1xf32, #tpu.memory_space<vmem>>, vector<1x1xf32>
    %20 = vector.broadcast %19 : vector<1x1xf32> to vector<1x32xf32>
    %21 = arith.addf %18, %20 : vector<1x32xf32>
    %cst_11 = arith.constant dense<0xFF800000> : vector<1xf32>
    %22 = vector.multi_reduction <maximumf>, %21, %cst_11 [1] : vector<1x32xf32> to vector<1xf32>
    %23 = vector.shape_cast %22 : vector<1xf32> to vector<1x1xf32>
    %24 = vector.broadcast %23 : vector<1x1xf32> to vector<1x32xf32>
    %25 = arith.subf %21, %24 : vector<1x32xf32>
    %26 = math.exp %25 : vector<1x32xf32>
    %cst_12 = arith.constant dense<0.000000e+00> : vector<1xf32>
    %27 = vector.multi_reduction <add>, %26, %cst_12 [1] : vector<1x32xf32> to vector<1xf32>
    %28 = vector.shape_cast %27 : vector<1xf32> to vector<1x1xf32>
    %29 = tpu.reciprocal %28 {approx = true} : vector<1x1xf32> -> vector<1x1xf32>
    %30 = vector.broadcast %29 : vector<1x1xf32> to vector<1x32xf32>
    %31 = arith.mulf %26, %30 : vector<1x32xf32>
    %c0_13 = arith.constant 0 : index
    %c0_14 = arith.constant 0 : index
    %32 = vector.load %arg9[%c0_13, %c0_14] : memref<1x32xf32, #tpu.memory_space<vmem>>, vector<1x32xf32>
    tpu.vector_store %arg9[%c0_13, %c0_14], %31 {strides = array<i32>} : memref<1x32xf32, #tpu.memory_space<vmem>>, vector<1x32xf32>,
    %cst_15 = arith.constant dense<0.000000e+00> : vector<1x128xf32>
    %33 = tpu.matmul %31, %0, %cst_15 {dimension_numbers = #tpu.dot_dimension_numbers<[1], [0], [0], [1], [0, 0, 1, 1], [], []>} : vector<1x32xf32>, vector<32x128xf32>, vector<1x128xf32> -> vector<1x128xf32>
    %c0_16 = arith.constant 0 : index
    %c0_17 = arith.constant 0 : index
    %34 = vector.load %arg6[%c0_16, %c0_17] : memref<128x1xf32, #tpu.memory_space<vmem>>, vector<128x1xf32>
    %cst_18 = arith.constant dense<0.000000e+00> : vector<1x1xf32>
    %35 = tpu.matmul %33, %34, %cst_18 {dimension_numbers = #tpu.dot_dimension_numbers<[1], [0], [0], [1], [0, 0, 1, 1], [], []>} : vector<1x128xf32>, vector<128x1xf32>, vector<1x1xf32> -> vector<1x1xf32>
    %c0_19 = arith.constant 0 : index
    %c0_20 = arith.constant 0 : index
    %36 = vector.load %arg7[%c0_19, %c0_20] : memref<1x1xf32, #tpu.memory_space<vmem>>, vector<1x1xf32>
    %37 = arith.addf %35, %36 : vector<1x1xf32>
    %c0_21 = arith.constant 0 : index
    %c0_22 = arith.constant 0 : index
    %38 = vector.load %arg8[%c0_21, %c0_22] : memref<1x1xf32, #tpu.memory_space<vmem>>, vector<1x1xf32>
    tpu.vector_store %arg8[%c0_21, %c0_22], %37 {strides = array<i32>} : memref<1x1xf32, #tpu.memory_space<vmem>>, vector<1x1xf32>,
    return
  }
  func.func @transform_0(%arg0: i32) -> (i32, i32) {
    %c0_i32 = arith.constant 0 : i32
    %c0_i32_0 = arith.constant 0 : i32
    %c0_i32_1 = arith.constant 0 : i32
    return %c0_i32, %c0_i32_0 : i32, i32
  }
  func.func @transform_1(%arg0: i32) -> (i32, i32) {
    %c0_i32 = arith.constant 0 : i32
    %c0_i32_0 = arith.constant 0 : i32
    %c0_i32_1 = arith.constant 0 : i32
    return %c0_i32, %c0_i32_0 : i32, i32
  }
  func.func @transform_2(%arg0: i32) -> (i32, i32) {
    %c0_i32 = arith.constant 0 : i32
    %c0_i32_0 = arith.constant 0 : i32
    %c0_i32_1 = arith.constant 0 : i32
    return %c0_i32, %c0_i32_0 : i32, i32
  }
  func.func @transform_3(%arg0: i32) -> (i32, i32) {
    %c0_i32 = arith.constant 0 : i32
    %c0_i32_0 = arith.constant 0 : i32
    %c0_i32_1 = arith.constant 0 : i32
    return %c0_i32, %c0_i32_0 : i32, i32
  }
  func.func @transform_4(%arg0: i32) -> (i32, i32) {
    %c0_i32 = arith.constant 0 : i32
    %c0_i32_0 = arith.constant 0 : i32
    %c0_i32_1 = arith.constant 0 : i32
    return %c0_i32, %c0_i32_0 : i32, i32
  }
  func.func @transform_5(%arg0: i32) -> (i32, i32) {
    %c0_i32 = arith.constant 0 : i32
    %c0_i32_0 = arith.constant 0 : i32
    %c0_i32_1 = arith.constant 0 : i32
    return %c0_i32, %c0_i32_0 : i32, i32
  }
  func.func @transform_6(%arg0: i32) -> (i32, i32) {
    %c0_i32 = arith.constant 0 : i32
    %c0_i32_0 = arith.constant 0 : i32
    %c0_i32_1 = arith.constant 0 : i32
    return %c0_i32, %c0_i32_0 : i32, i32
  }
  func.func @transform_7(%arg0: i32) -> (i32, i32) {
    %c0_i32 = arith.constant 0 : i32
    %c0_i32_0 = arith.constant 0 : i32
    %c0_i32_1 = arith.constant 0 : i32
    return %c0_i32, %c0_i32_0 : i32, i32
  }
  func.func @transform_8(%arg0: i32) -> (i32, i32) {
    %c0_i32 = arith.constant 0 : i32
    %c0_i32_0 = arith.constant 0 : i32
    %c0_i32_1 = arith.constant 0 : i32
    return %c0_i32, %c0_i32_0 : i32, i32
  }
}

</mosaic_0001>

<bundles_post_ra>
// kernel: squeeze.1
= control target key start
LH: loop header
LB: loop body
LE: loop exit
PB: predicated region body
PF: predicated region fallthrough
CT: control target
= control target key end

     0   :  { %2 = vsyncpa [#allocation1], 0  ;;  %s2101_s8 = smov [#allocation0]   ;;  %s4103_s0 = inlined_call_operand.hbm [shape: f32[1,3,64,128], index: 0, kind: input, shape index: {}]   ;;  %s4104_s1 = inlined_call_operand.vmem [shape: f32[3,4,16,8,16], index: 1, kind: output, shape index: {}]  }
   0x1   :  { %s6_s0 = sshll.u32 %s4103_s0, 4  ;;  %s8_s9 = sshll.u32 %s2101_s8, 4  ;;  %s7_s0 = int_to_ptr.hbm [resolvable:$true] %s6_s0  ;;  %s9_s9 = int_to_ptr.vmem [resolvable:$true] %s8_s9 }
   0x2   :  { %11 = dma.hbm_to_vmem [thread:$0]  %s7_s0, 3072, %s9_s9, [#allocation1]  }
   0x3   :  { %2099 = dma.done.wait [#allocation1], 3072  }
   0x4   :  { %2100 = vsyncadd [#allocation1], 4294964224  ;;  %v2122_v0 = vld [vmem:[#allocation0 + $0x10] sm:$0xff]   ;;  %v2124_v1 = vld [vmem:[#allocation0] sm:$0xff]   ;;  %s2102_s10 = smov 112   ;;  %s2103_s11 = smov 96  }
   0x5   :  { %198 = vrot.lane.b32.xlu1 %v2122_v0, %s2102_s10  ;;  %180 = vrot.lane.b32.xlu0 %v2124_v1, %s2102_s10  ;;  %v2130_v2 = vld [vmem:[#allocation0 + $0x20] sm:$0xff]   ;;  %v2134_v3 = vld [vmem:[#allocation0 + $0x18] sm:$0xff]   ;;  %v2136_v4 = vld [vmem:[#allocation0 + $0x8] sm:$0xff]   ;;  %vm15_vm0 = vcmask 130048   ;;  %s2104_s16 = smov 80   ;;  %s2105_s25 = smov 64  }
   0x6   :  { %216 = vrot.lane.b32.xlu2 %v2130_v2, %s2102_s10  ;;  %v2138_v5 = vld [vmem:[#allocation0 + $0x28] sm:$0xff]   ;;  %v2146_v6 = vld [vmem:[#allocation0 + $0x38] sm:$0xff]   ;;  %v2148_v7 = vld [vmem:[#allocation0 + $0x30] sm:$0xff]   ;;  %s2106_s5 = smov 48   ;;  %s2107_s17 = smov 32  }
   0x7   :  { %v2150_v8 = vld [vmem:[#allocation0 + $0x40] sm:$0xff]   ;;  %v2158_v9 = vld [vmem:[#allocation0 + $0x50] sm:$0xff]   ;;  %v2160_v10 = vld [vmem:[#allocation0 + $0x48] sm:$0xff]   ;;  %s2108_s29 = smov 16  }
   0x8   :  { %v2162_v11 = vld [vmem:[#allocation0 + $0x58] sm:$0xff]   ;;  %v2170_v12 = vld [vmem:[#allocation0 + $0x68] sm:$0xff]   ;;  %v2172_v13 = vld [vmem:[#allocation0 + $0x60] sm:$0xff]  }
   0x9   :  { %v2174_v14 = vld [vmem:[#allocation0 + $0x70] sm:$0xff]   ;;  %v2182_v15 = vld [vmem:[#allocation0 + $0x80] sm:$0xff]   ;;  %v2184_v16 = vld [vmem:[#allocation0 + $0x78] sm:$0xff]  }
   0xa   :  { %v2186_v17 = vld [vmem:[#allocation0 + $0x88] sm:$0xff]   ;;  %v2194_v18 = vld [vmem:[#allocation0 + $0x98] sm:$0xff]   ;;  %v2196_v19 = vld [vmem:[#allocation0 + $0x90] sm:$0xff]  }
   0xb   :  { %v2198_v20 = vld [vmem:[#allocation0 + $0xa0] sm:$0xff]   ;;  %v2206_v21 = vld [vmem:[#allocation0 + $0xb0] sm:$0xff]   ;;  %v2208_v22 = vld [vmem:[#allocation0 + $0xa8] sm:$0xff]  }
   0xc   :  { %v2210_v23 = vld [vmem:[#allocation0 + $0xb8] sm:$0xff]  }
   0xd   :  { %207 = vrot.lane.b32.xlu1 %v2134_v3, %s2102_s10  ;;  %189 = vrot.lane.b32.xlu0 %v2136_v4, %s2102_s10 }
   0xe   :  { %225 = vrot.lane.b32.xlu2 %v2138_v5, %s2102_s10 }
  0x15   :  { %243 = vrot.lane.b32.xlu1 %v2146_v6, %s2102_s10  ;;  %234 = vrot.lane.b32.xlu0 %v2148_v7, %s2102_s10 }
  0x16   :  { %252 = vrot.lane.b32.xlu2 %v2150_v8, %s2102_s10 }
  0x1d   :  { %270 = vrot.lane.b32.xlu1 %v2158_v9, %s2102_s10  ;;  %261 = vrot.lane.b32.xlu0 %v2160_v10, %s2102_s10 }
  0x1e   :  { %279 = vrot.lane.b32.xlu2 %v2162_v11, %s2102_s10 }
  0x25   :  { %297 = vrot.lane.b32.xlu1 %v2170_v12, %s2102_s10  ;;  %288 = vrot.lane.b32.xlu0 %v2172_v13, %s2102_s10 }
  0x26   :  { %306 = vrot.lane.b32.xlu2 %v2174_v14, %s2102_s10 }
  0x2d   :  { %324 = vrot.lane.b32.xlu1 %v2182_v15, %s2102_s10  ;;  %315 = vrot.lane.b32.xlu0 %v2184_v16, %s2102_s10 }
  0x2e   :  { %333 = vrot.lane.b32.xlu2 %v2186_v17, %s2102_s10 }
  0x35   :  { %351 = vrot.lane.b32.xlu1 %v2194_v18, %s2102_s10  ;;  %342 = vrot.lane.b32.xlu0 %v2196_v19, %s2102_s10 }
  0x36   :  { %360 = vrot.lane.b32.xlu2 %v2198_v20, %s2102_s10 }
  0x3d   :  { %378 = vrot.lane.b32.xlu1 %v2206_v21, %s2102_s10  ;;  %369 = vrot.lane.b32.xlu0 %v2208_v22, %s2102_s10 }
  0x3e   :  { %387 = vrot.lane.b32.xlu2 %v2210_v23, %s2102_s10 }
  0x45   :  { %404 = vrot.lane.b32.xlu1 %v2136_v4, %s2103_s11  ;;  %395 = vrot.lane.b32.xlu0 %v2124_v1, %s2103_s11 }
  0x46   :  { %413 = vrot.lane.b32.xlu2 %v2122_v0, %s2103_s11 }
  0x4d   :  { %431 = vrot.lane.b32.xlu1 %v2130_v2, %s2103_s11  ;;  %422 = vrot.lane.b32.xlu0 %v2134_v3, %s2103_s11 }
  0x4e   :  { %440 = vrot.lane.b32.xlu2 %v2138_v5, %s2103_s11 }
  0x55   :  { %458 = vrot.lane.b32.xlu1 %v2146_v6, %s2103_s11  ;;  %449 = vrot.lane.b32.xlu0 %v2148_v7, %s2103_s11 }
  0x56   :  { %467 = vrot.lane.b32.xlu2 %v2150_v8, %s2103_s11 }
  0x5d   :  { %485 = vrot.lane.b32.xlu1 %v2158_v9, %s2103_s11  ;;  %476 = vrot.lane.b32.xlu0 %v2160_v10, %s2103_s11 }
  0x5e   :  { %494 = vrot.lane.b32.xlu2 %v2162_v11, %s2103_s11 }
  0x60   :  { %v217_v24 = vpop.permute.xlu2 %216  }
  0x61   :  { %1739 = vst.msk [vmem:[%s4104_s1 + $0x101] ss:$8 sm:$0xf] %vm15_vm0, %v217_v24  }
  0x62   :  { %1740 = vst.msk [vmem:[%s4104_s1 + $0x101] ss:$8 sm:$0xf0] %vm15_vm0, %v217_v24  }
  0x65   :  { %512 = vrot.lane.b32.xlu1 %v2170_v12, %s2103_s11  ;;  %503 = vrot.lane.b32.xlu0 %v2172_v13, %s2103_s11 }
  0x66   :  { %521 = vrot.lane.b32.xlu2 %v2174_v14, %s2103_s11 }
  0x68   :  { %v226_v25 = vpop.permute.xlu2 %225  }
  0x69   :  { %1741 = vst.msk [vmem:[%s4104_s1 + $0x141] ss:$8 sm:$0xf] %vm15_vm0, %v226_v25  }
  0x6a   :  { %1742 = vst.msk [vmem:[%s4104_s1 + $0x141] ss:$8 sm:$0xf0] %vm15_vm0, %v226_v25  }
  0x6d   :  { %539 = vrot.lane.b32.xlu1 %v2182_v15, %s2103_s11  ;;  %530 = vrot.lane.b32.xlu0 %v2184_v16, %s2103_s11 }
  0x6e   :  { %548 = vrot.lane.b32.xlu2 %v2186_v17, %s2103_s11 }
  0x70   :  { %v253_v26 = vpop.permute.xlu2 %252  }
  0x71   :  { %1747 = vst.msk [vmem:[%s4104_s1 + $0x201] ss:$8 sm:$0xf] %vm15_vm0, %v253_v26  }
  0x72   :  { %1748 = vst.msk [vmem:[%s4104_s1 + $0x201] ss:$8 sm:$0xf0] %vm15_vm0, %v253_v26  }
  0x75   :  { %566 = vrot.lane.b32.xlu1 %v2194_v18, %s2103_s11  ;;  %557 = vrot.lane.b32.xlu0 %v2196_v19, %s2103_s11 }
  0x76   :  { %575 = vrot.lane.b32.xlu2 %v2198_v20, %s2103_s11 }
  0x77   :  { %v199_v27 = vpop.permute.xlu1 %198   ;;  %v181_v28 = vpop.permute.xlu0 %180  }
  0x78   :  { %1735 = vst.msk [vmem:[%s4104_s1 + $0x81] ss:$8 sm:$0xf] %vm15_vm0, %v199_v27   ;;  %v280_v29 = vpop.permute.xlu2 %279  }
  0x79   :  { %1736 = vst.msk [vmem:[%s4104_s1 + $0x81] ss:$8 sm:$0xf0] %vm15_vm0, %v199_v27  }
  0x7a   :  { %1731 = vst.msk [vmem:[%s4104_s1 + $0x1] ss:$8 sm:$0xf] %vm15_vm0, %v181_v28  }
  0x7b   :  { %1732 = vst.msk [vmem:[%s4104_s1 + $0x1] ss:$8 sm:$0xf0] %vm15_vm0, %v181_v28  }
  0x7c   :  { %1753 = vst.msk [vmem:[%s4104_s1 + $0x2c1] ss:$8 sm:$0xf] %vm15_vm0, %v280_v29  }
  0x7d   :  { %593 = vrot.lane.b32.xlu1 %v2206_v21, %s2103_s11  ;;  %584 = vrot.lane.b32.xlu0 %v2208_v22, %s2103_s11  ;;  %1754 = vst.msk [vmem:[%s4104_s1 + $0x2c1] ss:$8 sm:$0xf0] %vm15_vm0, %v280_v29  }
  0x7e   :  { %602 = vrot.lane.b32.xlu2 %v2210_v23, %s2103_s11 }
  0x7f   :  { %v208_v30 = vpop.permute.xlu1 %207   ;;  %v190_v31 = vpop.permute.xlu0 %189  }
  0x80   :  { %1737 = vst.msk [vmem:[%s4104_s1 + $0xc1] ss:$8 sm:$0xf] %vm15_vm0, %v208_v30   ;;  %v307_v32 = vpop.permute.xlu2 %306  }
  0x81   :  { %1738 = vst.msk [vmem:[%s4104_s1 + $0xc1] ss:$8 sm:$0xf0] %vm15_vm0, %v208_v30  }
  0x82   :  { %1733 = vst.msk [vmem:[%s4104_s1 + $0x41] ss:$8 sm:$0xf] %vm15_vm0, %v190_v31  }
  0x83   :  { %1734 = vst.msk [vmem:[%s4104_s1 + $0x41] ss:$8 sm:$0xf0] %vm15_vm0, %v190_v31  }
  0x84   :  { %1759 = vst.msk [vmem:[%s4104_s1 + $0x381] ss:$8 sm:$0xf] %vm15_vm0, %v307_v32  }
  0x85   :  { %619 = vrot.lane.b32.xlu1 %v2136_v4, %s2104_s16  ;;  %610 = vrot.lane.b32.xlu0 %v2124_v1, %s2104_s16  ;;  %1760 = vst.msk [vmem:[%s4104_s1 + $0x381] ss:$8 sm:$0xf0] %vm15_vm0, %v307_v32  }
  0x86   :  { %628 = vrot.lane.b32.xlu2 %v2122_v0, %s2104_s16 }
  0x87   :  { %v244_v33 = vpop.permute.xlu1 %243   ;;  %v235_v34 = vpop.permute.xlu0 %234  }
  0x88   :  { %1745 = vst.msk [vmem:[%s4104_s1 + $0x1c1] ss:$8 sm:$0xf] %vm15_vm0, %v244_v33   ;;  %v334_v35 = vpop.permute.xlu2 %333  }
  0x89   :  { %1746 = vst.msk [vmem:[%s4104_s1 + $0x1c1] ss:$8 sm:$0xf0] %vm15_vm0, %v244_v33  }
  0x8a   :  { %1743 = vst.msk [vmem:[%s4104_s1 + $0x181] ss:$8 sm:$0xf] %vm15_vm0, %v235_v34  }
  0x8b   :  { %1744 = vst.msk [vmem:[%s4104_s1 + $0x181] ss:$8 sm:$0xf0] %vm15_vm0, %v235_v34  }
  0x8c   :  { %1765 = vst.msk [vmem:[%s4104_s1 + $0x441] ss:$8 sm:$0xf] %vm15_vm0, %v334_v35  }
  0x8d   :  { %646 = vrot.lane.b32.xlu1 %v2130_v2, %s2104_s16  ;;  %637 = vrot.lane.b32.xlu0 %v2134_v3, %s2104_s16  ;;  %1766 = vst.msk [vmem:[%s4104_s1 + $0x441] ss:$8 sm:$0xf0] %vm15_vm0, %v334_v35  }
  0x8e   :  { %655 = vrot.lane.b32.xlu2 %v2138_v5, %s2104_s16 }
  0x8f   :  { %v271_v36 = vpop.permute.xlu1 %270   ;;  %v262_v37 = vpop.permute.xlu0 %261  }
  0x90   :  { %1751 = vst.msk [vmem:[%s4104_s1 + $0x281] ss:$8 sm:$0xf] %vm15_vm0, %v271_v36   ;;  %v361_v38 = vpop.permute.xlu2 %360  }
  0x91   :  { %1752 = vst.msk [vmem:[%s4104_s1 + $0x281] ss:$8 sm:$0xf0] %vm15_vm0, %v271_v36  }
  0x92   :  { %1749 = vst.msk [vmem:[%s4104_s1 + $0x241] ss:$8 sm:$0xf] %vm15_vm0, %v262_v37  }
  0x93   :  { %1750 = vst.msk [vmem:[%s4104_s1 + $0x241] ss:$8 sm:$0xf0] %vm15_vm0, %v262_v37  }
  0x94   :  { %1771 = vst.msk [vmem:[%s4104_s1 + $0x501] ss:$8 sm:$0xf] %vm15_vm0, %v361_v38  }
  0x95   :  { %673 = vrot.lane.b32.xlu1 %v2146_v6, %s2104_s16  ;;  %664 = vrot.lane.b32.xlu0 %v2148_v7, %s2104_s16  ;;  %1772 = vst.msk [vmem:[%s4104_s1 + $0x501] ss:$8 sm:$0xf0] %vm15_vm0, %v361_v38  }
  0x96   :  { %682 = vrot.lane.b32.xlu2 %v2150_v8, %s2104_s16 }
  0x97   :  { %v298_v39 = vpop.permute.xlu1 %297   ;;  %v289_v40 = vpop.permute.xlu0 %288  }
  0x98   :  { %1757 = vst.msk [vmem:[%s4104_s1 + $0x341] ss:$8 sm:$0xf] %vm15_vm0, %v298_v39   ;;  %v388_v41 = vpop.permute.xlu2 %387  }
  0x99   :  { %1758 = vst.msk [vmem:[%s4104_s1 + $0x341] ss:$8 sm:$0xf0] %vm15_vm0, %v298_v39  }
  0x9a   :  { %1755 = vst.msk [vmem:[%s4104_s1 + $0x301] ss:$8 sm:$0xf] %vm15_vm0, %v289_v40  }
  0x9b   :  { %1756 = vst.msk [vmem:[%s4104_s1 + $0x301] ss:$8 sm:$0xf0] %vm15_vm0, %v289_v40  }
  0x9c   :  { %1777 = vst.msk [vmem:[%s4104_s1 + $0x5c1] ss:$8 sm:$0xf] %vm15_vm0, %v388_v41  }
  0x9d   :  { %700 = vrot.lane.b32.xlu1 %v2158_v9, %s2104_s16  ;;  %691 = vrot.lane.b32.xlu0 %v2160_v10, %s2104_s16  ;;  %1778 = vst.msk [vmem:[%s4104_s1 + $0x5c1] ss:$8 sm:$0xf0] %vm15_vm0, %v388_v41  }
  0x9e   :  { %709 = vrot.lane.b32.xlu2 %v2162_v11, %s2104_s16 }
  0x9f   :  { %v325_v42 = vpop.permute.xlu1 %324   ;;  %v316_v43 = vpop.permute.xlu0 %315  }
  0xa0   :  { %1763 = vst.msk [vmem:[%s4104_s1 + $0x401] ss:$8 sm:$0xf] %vm15_vm0, %v325_v42   ;;  %v414_v44 = vpop.permute.xlu2 %413  }
  0xa1   :  { %1764 = vst.msk [vmem:[%s4104_s1 + $0x401] ss:$8 sm:$0xf0] %vm15_vm0, %v325_v42  }
  0xa2   :  { %1761 = vst.msk [vmem:[%s4104_s1 + $0x3c1] ss:$8 sm:$0xf] %vm15_vm0, %v316_v43  }
  0xa3   :  { %1762 = vst.msk [vmem:[%s4104_s1 + $0x3c1] ss:$8 sm:$0xf0] %vm15_vm0, %v316_v43  }
  0xa4   :  { %1783 = vst.msk [vmem:[%s4104_s1 + $0x82] ss:$8 sm:$0xf] %vm15_vm0, %v414_v44  }
  0xa5   :  { %727 = vrot.lane.b32.xlu1 %v2170_v12, %s2104_s16  ;;  %718 = vrot.lane.b32.xlu0 %v2172_v13, %s2104_s16  ;;  %1784 = vst.msk [vmem:[%s4104_s1 + $0x82] ss:$8 sm:$0xf0] %vm15_vm0, %v414_v44  }
  0xa6   :  { %736 = vrot.lane.b32.xlu2 %v2174_v14, %s2104_s16 }
  0xa7   :  { %v352_v45 = vpop.permute.xlu1 %351   ;;  %v343_v46 = vpop.permute.xlu0 %342  }
  0xa8   :  { %1769 = vst.msk [vmem:[%s4104_s1 + $0x4c1] ss:$8 sm:$0xf] %vm15_vm0, %v352_v45   ;;  %v441_v47 = vpop.permute.xlu2 %440  }
  0xa9   :  { %1770 = vst.msk [vmem:[%s4104_s1 + $0x4c1] ss:$8 sm:$0xf0] %vm15_vm0, %v352_v45  }
  0xaa   :  { %1767 = vst.msk [vmem:[%s4104_s1 + $0x481] ss:$8 sm:$0xf] %vm15_vm0, %v343_v46  }
  0xab   :  { %1768 = vst.msk [vmem:[%s4104_s1 + $0x481] ss:$8 sm:$0xf0] %vm15_vm0, %v343_v46  }
  0xac   :  { %1789 = vst.msk [vmem:[%s4104_s1 + $0x142] ss:$8 sm:$0xf] %vm15_vm0, %v441_v47  }
  0xad   :  { %754 = vrot.lane.b32.xlu1 %v2182_v15, %s2104_s16  ;;  %745 = vrot.lane.b32.xlu0 %v2184_v16, %s2104_s16  ;;  %1790 = vst.msk [vmem:[%s4104_s1 + $0x142] ss:$8 sm:$0xf0] %vm15_vm0, %v441_v47  }
  0xae   :  { %763 = vrot.lane.b32.xlu2 %v2186_v17, %s2104_s16 }
  0xaf   :  { %v379_v48 = vpop.permute.xlu1 %378   ;;  %v370_v49 = vpop.permute.xlu0 %369  }
  0xb0   :  { %1775 = vst.msk [vmem:[%s4104_s1 + $0x581] ss:$8 sm:$0xf] %vm15_vm0, %v379_v48   ;;  %v468_v50 = vpop.permute.xlu2 %467  }
  0xb1   :  { %1776 = vst.msk [vmem:[%s4104_s1 + $0x581] ss:$8 sm:$0xf0] %vm15_vm0, %v379_v48  }
  0xb2   :  { %1773 = vst.msk [vmem:[%s4104_s1 + $0x541] ss:$8 sm:$0xf] %vm15_vm0, %v370_v49  }
  0xb3   :  { %1774 = vst.msk [vmem:[%s4104_s1 + $0x541] ss:$8 sm:$0xf0] %vm15_vm0, %v370_v49  }
  0xb4   :  { %1795 = vst.msk [vmem:[%s4104_s1 + $0x202] ss:$8 sm:$0xf] %vm15_vm0, %v468_v50  }
  0xb5   :  { %781 = vrot.lane.b32.xlu1 %v2194_v18, %s2104_s16  ;;  %772 = vrot.lane.b32.xlu0 %v2196_v19, %s2104_s16  ;;  %1796 = vst.msk [vmem:[%s4104_s1 + $0x202] ss:$8 sm:$0xf0] %vm15_vm0, %v468_v50  }
  0xb6   :  { %790 = vrot.lane.b32.xlu2 %v2198_v20, %s2104_s16 }
  0xb7   :  { %v405_v51 = vpop.permute.xlu1 %404   ;;  %v396_v52 = vpop.permute.xlu0 %395  }
  0xb8   :  { %1781 = vst.msk [vmem:[%s4104_s1 + $0x42] ss:$8 sm:$0xf] %vm15_vm0, %v405_v51   ;;  %v495_v53 = vpop.permute.xlu2 %494  }
  0xb9   :  { %1782 = vst.msk [vmem:[%s4104_s1 + $0x42] ss:$8 sm:$0xf0] %vm15_vm0, %v405_v51  }
  0xba   :  { %1779 = vst.msk [vmem:[%s4104_s1 + $0x2] ss:$8 sm:$0xf] %vm15_vm0, %v396_v52  }
  0xbb   :  { %1780 = vst.msk [vmem:[%s4104_s1 + $0x2] ss:$8 sm:$0xf0] %vm15_vm0, %v396_v52  }
  0xbc   :  { %1801 = vst.msk [vmem:[%s4104_s1 + $0x2c2] ss:$8 sm:$0xf] %vm15_vm0, %v495_v53  }
  0xbd   :  { %808 = vrot.lane.b32.xlu1 %v2206_v21, %s2104_s16  ;;  %799 = vrot.lane.b32.xlu0 %v2208_v22, %s2104_s16  ;;  %1802 = vst.msk [vmem:[%s4104_s1 + $0x2c2] ss:$8 sm:$0xf0] %vm15_vm0, %v495_v53  }
  0xbe   :  { %817 = vrot.lane.b32.xlu2 %v2210_v23, %s2104_s16 }
  0xbf   :  { %v432_v54 = vpop.permute.xlu1 %431   ;;  %v423_v55 = vpop.permute.xlu0 %422  }
  0xc0   :  { %1787 = vst.msk [vmem:[%s4104_s1 + $0x102] ss:$8 sm:$0xf] %vm15_vm0, %v432_v54   ;;  %v522_v56 = vpop.permute.xlu2 %521  }
  0xc1   :  { %1788 = vst.msk [vmem:[%s4104_s1 + $0x102] ss:$8 sm:$0xf0] %vm15_vm0, %v432_v54  }
  0xc2   :  { %1785 = vst.msk [vmem:[%s4104_s1 + $0xc2] ss:$8 sm:$0xf] %vm15_vm0, %v423_v55  }
  0xc3   :  { %1786 = vst.msk [vmem:[%s4104_s1 + $0xc2] ss:$8 sm:$0xf0] %vm15_vm0, %v423_v55  }
  0xc4   :  { %1807 = vst.msk [vmem:[%s4104_s1 + $0x382] ss:$8 sm:$0xf] %vm15_vm0, %v522_v56  }
  0xc5   :  { %834 = vrot.lane.b32.xlu1 %v2136_v4, %s2105_s25  ;;  %825 = vrot.lane.b32.xlu0 %v2124_v1, %s2105_s25  ;;  %1808 = vst.msk [vmem:[%s4104_s1 + $0x382] ss:$8 sm:$0xf0] %vm15_vm0, %v522_v56  }
  0xc6   :  { %843 = vrot.lane.b32.xlu2 %v2122_v0, %s2105_s25 }
  0xc7   :  { %v459_v57 = vpop.permute.xlu1 %458   ;;  %v450_v58 = vpop.permute.xlu0 %449  }
  0xc8   :  { %1793 = vst.msk [vmem:[%s4104_s1 + $0x1c2] ss:$8 sm:$0xf] %vm15_vm0, %v459_v57   ;;  %v549_v59 = vpop.permute.xlu2 %548  }
  0xc9   :  { %1794 = vst.msk [vmem:[%s4104_s1 + $0x1c2] ss:$8 sm:$0xf0] %vm15_vm0, %v459_v57  }
  0xca   :  { %1791 = vst.msk [vmem:[%s4104_s1 + $0x182] ss:$8 sm:$0xf] %vm15_vm0, %v450_v58  }
  0xcb   :  { %1792 = vst.msk [vmem:[%s4104_s1 + $0x182] ss:$8 sm:$0xf0] %vm15_vm0, %v450_v58   ;;  %v3226_v58 = vld [vmem:[#allocation0 + $0x68] sm:$0xff]  }
  0xcc   :  { %1813 = vst.msk [vmem:[%s4104_s1 + $0x442] ss:$8 sm:$0xf] %vm15_vm0, %v549_v59  }
  0xcd   :  { %861 = vrot.lane.b32.xlu1 %v2130_v2, %s2105_s25  ;;  %852 = vrot.lane.b32.xlu0 %v2134_v3, %s2105_s25  ;;  %1814 = vst.msk [vmem:[%s4104_s1 + $0x442] ss:$8 sm:$0xf0] %vm15_vm0, %v549_v59   ;;  %v3236_v59 = vld [vmem:[#allocation0 + $0x70] sm:$0xff]  }
  0xce   :  { %870 = vrot.lane.b32.xlu2 %v2138_v5, %s2105_s25  ;;  %1709 = vst.msk [vmem:[%s4104_s1 + $0x340] ss:$8 sm:$0xf] %vm15_vm0, %v3226_v58  }
  0xcf   :  { %v486_v60 = vpop.permute.xlu1 %485   ;;  %v477_v61 = vpop.permute.xlu0 %476   ;;  %1710 = vst.msk [vmem:[%s4104_s1 + $0x340] ss:$8 sm:$0xf0] %vm15_vm0, %v3226_v58  }
  0xd0   :  { %1799 = vst.msk [vmem:[%s4104_s1 + $0x282] ss:$8 sm:$0xf] %vm15_vm0, %v486_v60   ;;  %v576_v62 = vpop.permute.xlu2 %575  }
  0xd1   :  { %1800 = vst.msk [vmem:[%s4104_s1 + $0x282] ss:$8 sm:$0xf0] %vm15_vm0, %v486_v60   ;;  %v3246_v60 = vld [vmem:[#allocation0] sm:$0xff]  }
  0xd2   :  { %1797 = vst.msk [vmem:[%s4104_s1 + $0x242] ss:$8 sm:$0xf] %vm15_vm0, %v477_v61  }
  0xd3   :  { %1798 = vst.msk [vmem:[%s4104_s1 + $0x242] ss:$8 sm:$0xf0] %vm15_vm0, %v477_v61  }
  0xd4   :  { %1819 = vst.msk [vmem:[%s4104_s1 + $0x502] ss:$8 sm:$0xf] %vm15_vm0, %v576_v62  }
  0xd5   :  { %888 = vrot.lane.b32.xlu1 %v2146_v6, %s2105_s25  ;;  %879 = vrot.lane.b32.xlu0 %v2148_v7, %s2105_s25  ;;  %1820 = vst.msk [vmem:[%s4104_s1 + $0x502] ss:$8 sm:$0xf0] %vm15_vm0, %v576_v62  }
  0xd6   :  { %897 = vrot.lane.b32.xlu2 %v2150_v8, %s2105_s25  ;;  %16 = vst.msk [vmem:[%s4104_s1] ss:$8 sm:$0xf] %vm15_vm0, %v3246_v60  }
  0xd7   :  { %v513_v63 = vpop.permute.xlu1 %512   ;;  %v504_v24 = vpop.permute.xlu0 %503   ;;  %17 = vst.msk [vmem:[%s4104_s1] ss:$8 sm:$0xf0] %vm15_vm0, %v3246_v60  }
  0xd8   :  { %1805 = vst.msk [vmem:[%s4104_s1 + $0x342] ss:$8 sm:$0xf] %vm15_vm0, %v513_v63   ;;  %v603_v25 = vpop.permute.xlu2 %602  }
  0xd9   :  { %1806 = vst.msk [vmem:[%s4104_s1 + $0x342] ss:$8 sm:$0xf0] %vm15_vm0, %v513_v63  }
  0xda   :  { %1803 = vst.msk [vmem:[%s4104_s1 + $0x302] ss:$8 sm:$0xf] %vm15_vm0, %v504_v24  }
  0xdb   :  { %1804 = vst.msk [vmem:[%s4104_s1 + $0x302] ss:$8 sm:$0xf0] %vm15_vm0, %v504_v24   ;;  %v3272_v24 = vld [vmem:[#allocation0 + $0x80] sm:$0xff]  }
  0xdc   :  { %1825 = vst.msk [vmem:[%s4104_s1 + $0x5c2] ss:$8 sm:$0xf] %vm15_vm0, %v603_v25  }
  0xdd   :  { %915 = vrot.lane.b32.xlu1 %v2158_v9, %s2105_s25  ;;  %906 = vrot.lane.b32.xlu0 %v2160_v10, %s2105_s25  ;;  %1826 = vst.msk [vmem:[%s4104_s1 + $0x5c2] ss:$8 sm:$0xf0] %vm15_vm0, %v603_v25   ;;  %v3274_v25 = vld [vmem:[#allocation0 + $0x78] sm:$0xff]  }
  0xde   :  { %924 = vrot.lane.b32.xlu2 %v2162_v11, %s2105_s25  ;;  %1711 = vst.msk [vmem:[%s4104_s1 + $0x380] ss:$8 sm:$0xf] %vm15_vm0, %v3236_v59  }
  0xdf   :  { %v540_v26 = vpop.permute.xlu1 %539   ;;  %v531_v27 = vpop.permute.xlu0 %530   ;;  %1712 = vst.msk [vmem:[%s4104_s1 + $0x380] ss:$8 sm:$0xf0] %vm15_vm0, %v3236_v59  }
  0xe0   :  { %1811 = vst.msk [vmem:[%s4104_s1 + $0x402] ss:$8 sm:$0xf] %vm15_vm0, %v540_v26   ;;  %v629_v28 = vpop.permute.xlu2 %628  }
  0xe1   :  { %1812 = vst.msk [vmem:[%s4104_s1 + $0x402] ss:$8 sm:$0xf0] %vm15_vm0, %v540_v26   ;;  %v3284_v26 = vld [vmem:[#allocation0 + $0x88] sm:$0xff]  }
  0xe2   :  { %1809 = vst.msk [vmem:[%s4104_s1 + $0x3c2] ss:$8 sm:$0xf] %vm15_vm0, %v531_v27  }
  0xe3   :  { %1810 = vst.msk [vmem:[%s4104_s1 + $0x3c2] ss:$8 sm:$0xf0] %vm15_vm0, %v531_v27   ;;  %v1478_v27 = vld [vmem:[#allocation0 + $0x8] sm:$0xff]  }
  0xe4   :  { %1831 = vst.msk [vmem:[%s4104_s1 + $0x83] ss:$8 sm:$0xf] %vm15_vm0, %v629_v28  }
  0xe5   :  { %942 = vrot.lane.b32.xlu1 %v2170_v12, %s2105_s25  ;;  %933 = vrot.lane.b32.xlu0 %v2172_v13, %s2105_s25  ;;  %1832 = vst.msk [vmem:[%s4104_s1 + $0x83] ss:$8 sm:$0xf0] %vm15_vm0, %v629_v28  }
  0xe6   :  { %951 = vrot.lane.b32.xlu2 %v2174_v14, %s2105_s25  ;;  %1685 = vst.msk [vmem:[%s4104_s1 + $0x40] ss:$8 sm:$0xf] %vm15_vm0, %v1478_v27  }
  0xe7   :  { %v567_v29 = vpop.permute.xlu1 %566   ;;  %v558_v30 = vpop.permute.xlu0 %557   ;;  %1686 = vst.msk [vmem:[%s4104_s1 + $0x40] ss:$8 sm:$0xf0] %vm15_vm0, %v1478_v27  }
  0xe8   :  { %1817 = vst.msk [vmem:[%s4104_s1 + $0x4c2] ss:$8 sm:$0xf] %vm15_vm0, %v567_v29   ;;  %v656_v31 = vpop.permute.xlu2 %655  }
  0xe9   :  { %1818 = vst.msk [vmem:[%s4104_s1 + $0x4c2] ss:$8 sm:$0xf0] %vm15_vm0, %v567_v29  }
  0xea   :  { %1815 = vst.msk [vmem:[%s4104_s1 + $0x482] ss:$8 sm:$0xf] %vm15_vm0, %v558_v30  }
  0xeb   :  { %1816 = vst.msk [vmem:[%s4104_s1 + $0x482] ss:$8 sm:$0xf0] %vm15_vm0, %v558_v30  }
  0xec   :  { %1837 = vst.msk [vmem:[%s4104_s1 + $0x143] ss:$8 sm:$0xf] %vm15_vm0, %v656_v31  }
  0xed   :  { %969 = vrot.lane.b32.xlu1 %v2182_v15, %s2105_s25  ;;  %960 = vrot.lane.b32.xlu0 %v2184_v16, %s2105_s25  ;;  %1838 = vst.msk [vmem:[%s4104_s1 + $0x143] ss:$8 sm:$0xf0] %vm15_vm0, %v656_v31   ;;  %v3316_v31 = vld [vmem:[#allocation0 + $0x98] sm:$0xff]  }
  0xee   :  { %978 = vrot.lane.b32.xlu2 %v2186_v17, %s2105_s25  ;;  %1713 = vst.msk [vmem:[%s4104_s1 + $0x3c0] ss:$8 sm:$0xf] %vm15_vm0, %v3274_v25  }
  0xef   :  { %v594_v32 = vpop.permute.xlu1 %593   ;;  %v585_v33 = vpop.permute.xlu0 %584   ;;  %1714 = vst.msk [vmem:[%s4104_s1 + $0x3c0] ss:$8 sm:$0xf0] %vm15_vm0, %v3274_v25  }
  0xf0   :  { %1823 = vst.msk [vmem:[%s4104_s1 + $0x582] ss:$8 sm:$0xf] %vm15_vm0, %v594_v32   ;;  %v683_v34 = vpop.permute.xlu2 %682  }
  0xf1   :  { %1824 = vst.msk [vmem:[%s4104_s1 + $0x582] ss:$8 sm:$0xf0] %vm15_vm0, %v594_v32   ;;  %v3318_v32 = vld [vmem:[#allocation0 + $0x90] sm:$0xff]  }
  0xf2   :  { %1821 = vst.msk [vmem:[%s4104_s1 + $0x542] ss:$8 sm:$0xf] %vm15_vm0, %v585_v33  }
  0xf3   :  { %1822 = vst.msk [vmem:[%s4104_s1 + $0x542] ss:$8 sm:$0xf0] %vm15_vm0, %v585_v33   ;;  %v3328_v33 = vld [vmem:[#allocation0 + $0xa0] sm:$0xff]  }
  0xf4   :  { %1843 = vst.msk [vmem:[%s4104_s1 + $0x203] ss:$8 sm:$0xf] %vm15_vm0, %v683_v34  }
  0xf5   :  { %996 = vrot.lane.b32.xlu1 %v2194_v18, %s2105_s25  ;;  %987 = vrot.lane.b32.xlu0 %v2196_v19, %s2105_s25  ;;  %1844 = vst.msk [vmem:[%s4104_s1 + $0x203] ss:$8 sm:$0xf0] %vm15_vm0, %v683_v34   ;;  %v1496_v34 = vld [vmem:[#allocation0 + $0x18] sm:$0xff]  }
  0xf6   :  { %1005 = vrot.lane.b32.xlu2 %v2198_v20, %s2105_s25  ;;  %1689 = vst.msk [vmem:[%s4104_s1 + $0xc0] ss:$8 sm:$0xf] %vm15_vm0, %v1496_v34  }
  0xf7   :  { %v620_v35 = vpop.permute.xlu1 %619   ;;  %v611_v36 = vpop.permute.xlu0 %610   ;;  %1690 = vst.msk [vmem:[%s4104_s1 + $0xc0] ss:$8 sm:$0xf0] %vm15_vm0, %v1496_v34  }
  0xf8   :  { %1829 = vst.msk [vmem:[%s4104_s1 + $0x43] ss:$8 sm:$0xf] %vm15_vm0, %v620_v35   ;;  %v710_v37 = vpop.permute.xlu2 %709  }
  0xf9   :  { %1830 = vst.msk [vmem:[%s4104_s1 + $0x43] ss:$8 sm:$0xf0] %vm15_vm0, %v620_v35  }
  0xfa   :  { %1827 = vst.msk [vmem:[%s4104_s1 + $0x3] ss:$8 sm:$0xf] %vm15_vm0, %v611_v36  }
  0xfb   :  { %1828 = vst.msk [vmem:[%s4104_s1 + $0x3] ss:$8 sm:$0xf0] %vm15_vm0, %v611_v36  }
  0xfc   :  { %1849 = vst.msk [vmem:[%s4104_s1 + $0x2c3] ss:$8 sm:$0xf] %vm15_vm0, %v710_v37  }
  0xfd   :  { %1023 = vrot.lane.b32.xlu1 %v2206_v21, %s2105_s25  ;;  %1014 = vrot.lane.b32.xlu0 %v2208_v22, %s2105_s25  ;;  %1850 = vst.msk [vmem:[%s4104_s1 + $0x2c3] ss:$8 sm:$0xf0] %vm15_vm0, %v710_v37  }
  0xfe   :  { %1032 = vrot.lane.b32.xlu2 %v2210_v23, %s2105_s25  ;;  %1715 = vst.msk [vmem:[%s4104_s1 + $0x400] ss:$8 sm:$0xf] %vm15_vm0, %v3272_v24  }
  0xff   :  { %v647_v38 = vpop.permute.xlu1 %646   ;;  %v638_v39 = vpop.permute.xlu0 %637   ;;  %1716 = vst.msk [vmem:[%s4104_s1 + $0x400] ss:$8 sm:$0xf0] %vm15_vm0, %v3272_v24  }
 0x100   :  { %1835 = vst.msk [vmem:[%s4104_s1 + $0x103] ss:$8 sm:$0xf] %vm15_vm0, %v647_v38   ;;  %v737_v40 = vpop.permute.xlu2 %736  }
 0x101   :  { %1836 = vst.msk [vmem:[%s4104_s1 + $0x103] ss:$8 sm:$0xf0] %vm15_vm0, %v647_v38   ;;  %v3360_v38 = vld [vmem:[#allocation0 + $0xb0] sm:$0xff]  }
 0x102   :  { %1833 = vst.msk [vmem:[%s4104_s1 + $0xc3] ss:$8 sm:$0xf] %vm15_vm0, %v638_v39  }
 0x103   :  { %1834 = vst.msk [vmem:[%s4104_s1 + $0xc3] ss:$8 sm:$0xf0] %vm15_vm0, %v638_v39   ;;  %v3362_v39 = vld [vmem:[#allocation0 + $0xa8] sm:$0xff]  }
 0x104   :  { %1855 = vst.msk [vmem:[%s4104_s1 + $0x383] ss:$8 sm:$0xf] %vm15_vm0, %v737_v40  }
 0x105   :  { %1049 = vrot.lane.b32.xlu1 %v2136_v4, %s2106_s5  ;;  %1040 = vrot.lane.b32.xlu0 %v2124_v1, %s2106_s5  ;;  %1856 = vst.msk [vmem:[%s4104_s1 + $0x383] ss:$8 sm:$0xf0] %vm15_vm0, %v737_v40   ;;  %v3372_v40 = vld [vmem:[#allocation0 + $0xb8] sm:$0xff]  }
 0x106   :  { %1058 = vrot.lane.b32.xlu2 %v2122_v0, %s2106_s5  ;;  %1717 = vst.msk [vmem:[%s4104_s1 + $0x440] ss:$8 sm:$0xf] %vm15_vm0, %v3284_v26  }
 0x107   :  { %v674_v41 = vpop.permute.xlu1 %673   ;;  %v665_v42 = vpop.permute.xlu0 %664   ;;  %1718 = vst.msk [vmem:[%s4104_s1 + $0x440] ss:$8 sm:$0xf0] %vm15_vm0, %v3284_v26  }
 0x108   :  { %1841 = vst.msk [vmem:[%s4104_s1 + $0x1c3] ss:$8 sm:$0xf] %vm15_vm0, %v674_v41   ;;  %v764_v0 = vpop.permute.xlu2 %763  }
 0x109   :  { %1842 = vst.msk [vmem:[%s4104_s1 + $0x1c3] ss:$8 sm:$0xf0] %vm15_vm0, %v674_v41   ;;  %v1505_v41 = vld [vmem:[#allocation0 + $0x20] sm:$0xff]  }
 0x10a   :  { %1839 = vst.msk [vmem:[%s4104_s1 + $0x183] ss:$8 sm:$0xf] %vm15_vm0, %v665_v42  }
 0x10b   :  { %1840 = vst.msk [vmem:[%s4104_s1 + $0x183] ss:$8 sm:$0xf0] %vm15_vm0, %v665_v42  }
 0x10c   :  { %1861 = vst.msk [vmem:[%s4104_s1 + $0x443] ss:$8 sm:$0xf] %vm15_vm0, %v764_v0  }
 0x10d   :  { %1076 = vrot.lane.b32.xlu1 %v2130_v2, %s2106_s5  ;;  %1067 = vrot.lane.b32.xlu0 %v2134_v3, %s2106_s5  ;;  %1862 = vst.msk [vmem:[%s4104_s1 + $0x443] ss:$8 sm:$0xf0] %vm15_vm0, %v764_v0  }
 0x10e   :  { %1085 = vrot.lane.b32.xlu2 %v2138_v5, %s2106_s5  ;;  %1691 = vst.msk [vmem:[%s4104_s1 + $0x100] ss:$8 sm:$0xf] %vm15_vm0, %v1505_v41  }
 0x10f   :  { %v701_v43 = vpop.permute.xlu1 %700   ;;  %v692_v44 = vpop.permute.xlu0 %691   ;;  %1692 = vst.msk [vmem:[%s4104_s1 + $0x100] ss:$8 sm:$0xf0] %vm15_vm0, %v1505_v41  }
 0x110   :  { %1847 = vst.msk [vmem:[%s4104_s1 + $0x283] ss:$8 sm:$0xf] %vm15_vm0, %v701_v43   ;;  %v791_v5 = vpop.permute.xlu2 %790  }
 0x111   :  { %1848 = vst.msk [vmem:[%s4104_s1 + $0x283] ss:$8 sm:$0xf0] %vm15_vm0, %v701_v43  }
 0x112   :  { %1845 = vst.msk [vmem:[%s4104_s1 + $0x243] ss:$8 sm:$0xf] %vm15_vm0, %v692_v44  }
 0x113   :  { %1846 = vst.msk [vmem:[%s4104_s1 + $0x243] ss:$8 sm:$0xf0] %vm15_vm0, %v692_v44   ;;  %v1523_v44 = vld [vmem:[#allocation0 + $0x30] sm:$0xff]  }
 0x114   :  { %1867 = vst.msk [vmem:[%s4104_s1 + $0x503] ss:$8 sm:$0xf] %vm15_vm0, %v791_v5  }
 0x115   :  { %1103 = vrot.lane.b32.xlu1 %v2146_v6, %s2106_s5  ;;  %1094 = vrot.lane.b32.xlu0 %v2148_v7, %s2106_s5  ;;  %1868 = vst.msk [vmem:[%s4104_s1 + $0x503] ss:$8 sm:$0xf0] %vm15_vm0, %v791_v5  }
 0x116   :  { %1112 = vrot.lane.b32.xlu2 %v2150_v8, %s2106_s5  ;;  %1695 = vst.msk [vmem:[%s4104_s1 + $0x180] ss:$8 sm:$0xf] %vm15_vm0, %v1523_v44  }
 0x117   :  { %v728_v45 = vpop.permute.xlu1 %727   ;;  %v719_v46 = vpop.permute.xlu0 %718   ;;  %1696 = vst.msk [vmem:[%s4104_s1 + $0x180] ss:$8 sm:$0xf0] %vm15_vm0, %v1523_v44  }
 0x118   :  { %1853 = vst.msk [vmem:[%s4104_s1 + $0x343] ss:$8 sm:$0xf] %vm15_vm0, %v728_v45   ;;  %v818_v8 = vpop.permute.xlu2 %817  }
 0x119   :  { %1854 = vst.msk [vmem:[%s4104_s1 + $0x343] ss:$8 sm:$0xf0] %vm15_vm0, %v728_v45  }
 0x11a   :  { %1851 = vst.msk [vmem:[%s4104_s1 + $0x303] ss:$8 sm:$0xf] %vm15_vm0, %v719_v46  }
 0x11b   :  { %1852 = vst.msk [vmem:[%s4104_s1 + $0x303] ss:$8 sm:$0xf0] %vm15_vm0, %v719_v46  }
 0x11c   :  { %1873 = vst.msk [vmem:[%s4104_s1 + $0x5c3] ss:$8 sm:$0xf] %vm15_vm0, %v818_v8  }
 0x11d   :  { %1130 = vrot.lane.b32.xlu1 %v2158_v9, %s2106_s5  ;;  %1121 = vrot.lane.b32.xlu0 %v2160_v10, %s2106_s5  ;;  %1874 = vst.msk [vmem:[%s4104_s1 + $0x5c3] ss:$8 sm:$0xf0] %vm15_vm0, %v818_v8   ;;  %v1532_v8 = vld [vmem:[#allocation0 + $0x38] sm:$0xff]  }
 0x11e   :  { %1139 = vrot.lane.b32.xlu2 %v2162_v11, %s2106_s5  ;;  %1697 = vst.msk [vmem:[%s4104_s1 + $0x1c0] ss:$8 sm:$0xf] %vm15_vm0, %v1532_v8  }
 0x11f   :  { %v755_v47 = vpop.permute.xlu1 %754   ;;  %v746_v48 = vpop.permute.xlu0 %745   ;;  %1698 = vst.msk [vmem:[%s4104_s1 + $0x1c0] ss:$8 sm:$0xf0] %vm15_vm0, %v1532_v8  }
 0x120   :  { %1859 = vst.msk [vmem:[%s4104_s1 + $0x403] ss:$8 sm:$0xf] %vm15_vm0, %v755_v47   ;;  %v844_v11 = vpop.permute.xlu2 %843  }
 0x121   :  { %1860 = vst.msk [vmem:[%s4104_s1 + $0x403] ss:$8 sm:$0xf0] %vm15_vm0, %v755_v47  }
 0x122   :  { %1857 = vst.msk [vmem:[%s4104_s1 + $0x3c3] ss:$8 sm:$0xf] %vm15_vm0, %v746_v48  }
 0x123   :  { %1858 = vst.msk [vmem:[%s4104_s1 + $0x3c3] ss:$8 sm:$0xf0] %vm15_vm0, %v746_v48  }
 0x124   :  { %1879 = vst.msk [vmem:[%s4104_s1 + $0x84] ss:$8 sm:$0xf] %vm15_vm0, %v844_v11  }
 0x125   :  { %1157 = vrot.lane.b32.xlu1 %v2170_v12, %s2106_s5  ;;  %1148 = vrot.lane.b32.xlu0 %v2172_v13, %s2106_s5  ;;  %1880 = vst.msk [vmem:[%s4104_s1 + $0x84] ss:$8 sm:$0xf0] %vm15_vm0, %v844_v11  }
 0x126   :  { %1166 = vrot.lane.b32.xlu2 %v2174_v14, %s2106_s5  ;;  %1719 = vst.msk [vmem:[%s4104_s1 + $0x480] ss:$8 sm:$0xf] %vm15_vm0, %v3318_v32  }
 0x127   :  { %v782_v12 = vpop.permute.xlu1 %781   ;;  %v773_v13 = vpop.permute.xlu0 %772   ;;  %1720 = vst.msk [vmem:[%s4104_s1 + $0x480] ss:$8 sm:$0xf0] %vm15_vm0, %v3318_v32  }
 0x128   :  { %1865 = vst.msk [vmem:[%s4104_s1 + $0x4c3] ss:$8 sm:$0xf] %vm15_vm0, %v782_v12   ;;  %v871_v14 = vpop.permute.xlu2 %870  }
 0x129   :  { %1866 = vst.msk [vmem:[%s4104_s1 + $0x4c3] ss:$8 sm:$0xf0] %vm15_vm0, %v782_v12   ;;  %v1550_v12 = vld [vmem:[#allocation0 + $0x48] sm:$0xff]  }
 0x12a   :  { %1863 = vst.msk [vmem:[%s4104_s1 + $0x483] ss:$8 sm:$0xf] %vm15_vm0, %v773_v13  }
 0x12b   :  { %1864 = vst.msk [vmem:[%s4104_s1 + $0x483] ss:$8 sm:$0xf0] %vm15_vm0, %v773_v13  }
 0x12c   :  { %1885 = vst.msk [vmem:[%s4104_s1 + $0x144] ss:$8 sm:$0xf] %vm15_vm0, %v871_v14  }
 0x12d   :  { %1184 = vrot.lane.b32.xlu1 %v2182_v15, %s2106_s5  ;;  %1175 = vrot.lane.b32.xlu0 %v2184_v16, %s2106_s5  ;;  %1886 = vst.msk [vmem:[%s4104_s1 + $0x144] ss:$8 sm:$0xf0] %vm15_vm0, %v871_v14  }
 0x12e   :  { %1193 = vrot.lane.b32.xlu2 %v2186_v17, %s2106_s5  ;;  %1701 = vst.msk [vmem:[%s4104_s1 + $0x240] ss:$8 sm:$0xf] %vm15_vm0, %v1550_v12  }
 0x12f   :  { %v809_v15 = vpop.permute.xlu1 %808   ;;  %v800_v16 = vpop.permute.xlu0 %799   ;;  %1702 = vst.msk [vmem:[%s4104_s1 + $0x240] ss:$8 sm:$0xf0] %vm15_vm0, %v1550_v12  }
 0x130   :  { %1871 = vst.msk [vmem:[%s4104_s1 + $0x583] ss:$8 sm:$0xf] %vm15_vm0, %v809_v15   ;;  %v898_v17 = vpop.permute.xlu2 %897  }
 0x131   :  { %1872 = vst.msk [vmem:[%s4104_s1 + $0x583] ss:$8 sm:$0xf0] %vm15_vm0, %v809_v15  }
 0x132   :  { %1869 = vst.msk [vmem:[%s4104_s1 + $0x543] ss:$8 sm:$0xf] %vm15_vm0, %v800_v16  }
 0x133   :  { %1870 = vst.msk [vmem:[%s4104_s1 + $0x543] ss:$8 sm:$0xf0] %vm15_vm0, %v800_v16   ;;  %v1559_v16 = vld [vmem:[#allocation0 + $0x50] sm:$0xff]  }
 0x134   :  { %1891 = vst.msk [vmem:[%s4104_s1 + $0x204] ss:$8 sm:$0xf] %vm15_vm0, %v898_v17  }
 0x135   :  { %1211 = vrot.lane.b32.xlu1 %v2194_v18, %s2106_s5  ;;  %1202 = vrot.lane.b32.xlu0 %v2196_v19, %s2106_s5  ;;  %1892 = vst.msk [vmem:[%s4104_s1 + $0x204] ss:$8 sm:$0xf0] %vm15_vm0, %v898_v17  }
 0x136   :  { %1220 = vrot.lane.b32.xlu2 %v2198_v20, %s2106_s5  ;;  %1703 = vst.msk [vmem:[%s4104_s1 + $0x280] ss:$8 sm:$0xf] %vm15_vm0, %v1559_v16  }
 0x137   :  { %v835_v18 = vpop.permute.xlu1 %834   ;;  %v826_v19 = vpop.permute.xlu0 %825   ;;  %1704 = vst.msk [vmem:[%s4104_s1 + $0x280] ss:$8 sm:$0xf0] %vm15_vm0, %v1559_v16  }
 0x138   :  { %1877 = vst.msk [vmem:[%s4104_s1 + $0x44] ss:$8 sm:$0xf] %vm15_vm0, %v835_v18   ;;  %v925_v20 = vpop.permute.xlu2 %924  }
 0x139   :  { %1878 = vst.msk [vmem:[%s4104_s1 + $0x44] ss:$8 sm:$0xf0] %vm15_vm0, %v835_v18  }
 0x13a   :  { %1875 = vst.msk [vmem:[%s4104_s1 + $0x4] ss:$8 sm:$0xf] %vm15_vm0, %v826_v19  }
 0x13b   :  { %1876 = vst.msk [vmem:[%s4104_s1 + $0x4] ss:$8 sm:$0xf0] %vm15_vm0, %v826_v19  }
 0x13c   :  { %1897 = vst.msk [vmem:[%s4104_s1 + $0x2c4] ss:$8 sm:$0xf] %vm15_vm0, %v925_v20  }
 0x13d   :  { %1238 = vrot.lane.b32.xlu1 %v2206_v21, %s2106_s5  ;;  %1229 = vrot.lane.b32.xlu0 %v2208_v22, %s2106_s5  ;;  %1898 = vst.msk [vmem:[%s4104_s1 + $0x2c4] ss:$8 sm:$0xf0] %vm15_vm0, %v925_v20   ;;  %v3032_v21 = vld [vmem:[#allocation0 + $0x10] sm:$0xff]  }
 0x13e   :  { %1687 = vst.msk [vmem:[%s4104_s1 + $0x80] ss:$8 sm:$0xf] %vm15_vm0, %v3032_v21   ;;  %1247 = vrot.lane.b32.xlu2 %v2210_v23, %s2106_s5 }
 0x13f   :  { %v862_v22 = vpop.permute.xlu1 %861   ;;  %v853_v49 = vpop.permute.xlu0 %852   ;;  %1688 = vst.msk [vmem:[%s4104_s1 + $0x80] ss:$8 sm:$0xf0] %vm15_vm0, %v3032_v21  }
 0x140   :  { %1883 = vst.msk [vmem:[%s4104_s1 + $0x104] ss:$8 sm:$0xf] %vm15_vm0, %v862_v22   ;;  %v952_v23 = vpop.permute.xlu2 %951  }
 0x141   :  { %1884 = vst.msk [vmem:[%s4104_s1 + $0x104] ss:$8 sm:$0xf0] %vm15_vm0, %v862_v22  }
 0x142   :  { %1881 = vst.msk [vmem:[%s4104_s1 + $0xc4] ss:$8 sm:$0xf] %vm15_vm0, %v853_v49  }
 0x143   :  { %1882 = vst.msk [vmem:[%s4104_s1 + $0xc4] ss:$8 sm:$0xf0] %vm15_vm0, %v853_v49  }
 0x144   :  { %1903 = vst.msk [vmem:[%s4104_s1 + $0x384] ss:$8 sm:$0xf] %vm15_vm0, %v952_v23  }
 0x145   :  { %1264 = vrot.lane.b32.xlu1 %v2136_v4, %s2107_s17  ;;  %1255 = vrot.lane.b32.xlu0 %v2124_v1, %s2107_s17  ;;  %1904 = vst.msk [vmem:[%s4104_s1 + $0x384] ss:$8 sm:$0xf0] %vm15_vm0, %v952_v23   ;;  %v3074_v1 = vld [vmem:[#allocation0 + $0x28] sm:$0xff]  }
 0x146   :  { %1693 = vst.msk [vmem:[%s4104_s1 + $0x140] ss:$8 sm:$0xf] %vm15_vm0, %v3074_v1   ;;  %1273 = vrot.lane.b32.xlu2 %v3032_v21, %s2107_s17 }
 0x147   :  { %v889_v4 = vpop.permute.xlu1 %888   ;;  %v880_v50 = vpop.permute.xlu0 %879   ;;  %1694 = vst.msk [vmem:[%s4104_s1 + $0x140] ss:$8 sm:$0xf0] %vm15_vm0, %v3074_v1  }
 0x148   :  { %1889 = vst.msk [vmem:[%s4104_s1 + $0x1c4] ss:$8 sm:$0xf] %vm15_vm0, %v889_v4   ;;  %v979_v51 = vpop.permute.xlu2 %978  }
 0x149   :  { %1890 = vst.msk [vmem:[%s4104_s1 + $0x1c4] ss:$8 sm:$0xf0] %vm15_vm0, %v889_v4  }
 0x14a   :  { %1887 = vst.msk [vmem:[%s4104_s1 + $0x184] ss:$8 sm:$0xf] %vm15_vm0, %v880_v50  }
 0x14b   :  { %1888 = vst.msk [vmem:[%s4104_s1 + $0x184] ss:$8 sm:$0xf0] %vm15_vm0, %v880_v50  }
 0x14c   :  { %1909 = vst.msk [vmem:[%s4104_s1 + $0x444] ss:$8 sm:$0xf] %vm15_vm0, %v979_v51  }
 0x14d   :  { %1291 = vrot.lane.b32.xlu1 %v2130_v2, %s2107_s17  ;;  %1282 = vrot.lane.b32.xlu0 %v2134_v3, %s2107_s17  ;;  %1910 = vst.msk [vmem:[%s4104_s1 + $0x444] ss:$8 sm:$0xf0] %vm15_vm0, %v979_v51   ;;  %v3116_v2 = vld [vmem:[#allocation0 + $0x40] sm:$0xff]  }
 0x14e   :  { %1699 = vst.msk [vmem:[%s4104_s1 + $0x200] ss:$8 sm:$0xf] %vm15_vm0, %v3116_v2   ;;  %1300 = vrot.lane.b32.xlu2 %v3074_v1, %s2107_s17 }
 0x14f   :  { %v916_v3 = vpop.permute.xlu1 %915   ;;  %v907_v52 = vpop.permute.xlu0 %906   ;;  %1700 = vst.msk [vmem:[%s4104_s1 + $0x200] ss:$8 sm:$0xf0] %vm15_vm0, %v3116_v2  }
 0x150   :  { %1895 = vst.msk [vmem:[%s4104_s1 + $0x284] ss:$8 sm:$0xf] %vm15_vm0, %v916_v3   ;;  %v1006_v53 = vpop.permute.xlu2 %1005  }
 0x151   :  { %1896 = vst.msk [vmem:[%s4104_s1 + $0x284] ss:$8 sm:$0xf0] %vm15_vm0, %v916_v3  }
 0x152   :  { %1893 = vst.msk [vmem:[%s4104_s1 + $0x244] ss:$8 sm:$0xf] %vm15_vm0, %v907_v52  }
 0x153   :  { %1894 = vst.msk [vmem:[%s4104_s1 + $0x244] ss:$8 sm:$0xf0] %vm15_vm0, %v907_v52  }
 0x154   :  { %1915 = vst.msk [vmem:[%s4104_s1 + $0x504] ss:$8 sm:$0xf] %vm15_vm0, %v1006_v53  }
 0x155   :  { %1318 = vrot.lane.b32.xlu1 %v2146_v6, %s2107_s17  ;;  %1309 = vrot.lane.b32.xlu0 %v2148_v7, %s2107_s17  ;;  %1916 = vst.msk [vmem:[%s4104_s1 + $0x504] ss:$8 sm:$0xf0] %vm15_vm0, %v1006_v53   ;;  %v3158_v6 = vld [vmem:[#allocation0 + $0x58] sm:$0xff]  }
 0x156   :  { %1705 = vst.msk [vmem:[%s4104_s1 + $0x2c0] ss:$8 sm:$0xf] %vm15_vm0, %v3158_v6   ;;  %1327 = vrot.lane.b32.xlu2 %v3116_v2, %s2107_s17 }
 0x157   :  { %v943_v7 = vpop.permute.xlu1 %942   ;;  %v934_v54 = vpop.permute.xlu0 %933   ;;  %1706 = vst.msk [vmem:[%s4104_s1 + $0x2c0] ss:$8 sm:$0xf0] %vm15_vm0, %v3158_v6  }
 0x158   :  { %1901 = vst.msk [vmem:[%s4104_s1 + $0x344] ss:$8 sm:$0xf] %vm15_vm0, %v943_v7   ;;  %v1033_v55 = vpop.permute.xlu2 %1032  }
 0x159   :  { %1902 = vst.msk [vmem:[%s4104_s1 + $0x344] ss:$8 sm:$0xf0] %vm15_vm0, %v943_v7  }
 0x15a   :  { %1899 = vst.msk [vmem:[%s4104_s1 + $0x304] ss:$8 sm:$0xf] %vm15_vm0, %v934_v54  }
 0x15b   :  { %1900 = vst.msk [vmem:[%s4104_s1 + $0x304] ss:$8 sm:$0xf0] %vm15_vm0, %v934_v54  }
 0x15c   :  { %1921 = vst.msk [vmem:[%s4104_s1 + $0x5c4] ss:$8 sm:$0xf] %vm15_vm0, %v1033_v55  }
 0x15d   :  { %1345 = vrot.lane.b32.xlu1 %v2158_v9, %s2107_s17  ;;  %1336 = vrot.lane.b32.xlu0 %v2160_v10, %s2107_s17  ;;  %v3196_v9 = vld [vmem:[#allocation0 + $0x60] sm:$0xff]   ;;  %1922 = vst.msk [vmem:[%s4104_s1 + $0x5c4] ss:$8 sm:$0xf0] %vm15_vm0, %v1033_v55  }
 0x15e   :  { %1707 = vst.msk [vmem:[%s4104_s1 + $0x300] ss:$8 sm:$0xf] %vm15_vm0, %v3196_v9   ;;  %1354 = vrot.lane.b32.xlu2 %v3158_v6, %s2107_s17 }
 0x15f   :  { %v970_v10 = vpop.permute.xlu1 %969   ;;  %v961_v56 = vpop.permute.xlu0 %960   ;;  %1708 = vst.msk [vmem:[%s4104_s1 + $0x300] ss:$8 sm:$0xf0] %vm15_vm0, %v3196_v9  }
 0x160   :  { %1907 = vst.msk [vmem:[%s4104_s1 + $0x404] ss:$8 sm:$0xf] %vm15_vm0, %v970_v10   ;;  %v1059_v57 = vpop.permute.xlu2 %1058  }
 0x161   :  { %1908 = vst.msk [vmem:[%s4104_s1 + $0x404] ss:$8 sm:$0xf0] %vm15_vm0, %v970_v10  }
 0x162   :  { %1905 = vst.msk [vmem:[%s4104_s1 + $0x3c4] ss:$8 sm:$0xf] %vm15_vm0, %v961_v56  }
 0x163   :  { %1906 = vst.msk [vmem:[%s4104_s1 + $0x3c4] ss:$8 sm:$0xf0] %vm15_vm0, %v961_v56  }
 0x164   :  { %1927 = vst.msk [vmem:[%s4104_s1 + $0x85] ss:$8 sm:$0xf] %vm15_vm0, %v1059_v57  }
 0x165   :  { %1372 = vrot.lane.b32.xlu1 %v3226_v58, %s2107_s17  ;;  %1363 = vrot.lane.b32.xlu0 %v3196_v9, %s2107_s17  ;;  %1928 = vst.msk [vmem:[%s4104_s1 + $0x85] ss:$8 sm:$0xf0] %vm15_vm0, %v1059_v57  }
 0x166   :  { %1381 = vrot.lane.b32.xlu2 %v3236_v59, %s2107_s17  ;;  %1721 = vst.msk [vmem:[%s4104_s1 + $0x4c0] ss:$8 sm:$0xf] %vm15_vm0, %v3316_v31  }
 0x167   :  { %v997_v61 = vpop.permute.xlu1 %996   ;;  %v988_v62 = vpop.permute.xlu0 %987   ;;  %1722 = vst.msk [vmem:[%s4104_s1 + $0x4c0] ss:$8 sm:$0xf0] %vm15_vm0, %v3316_v31  }
 0x168   :  { %1913 = vst.msk [vmem:[%s4104_s1 + $0x4c4] ss:$8 sm:$0xf] %vm15_vm0, %v997_v61   ;;  %v1086_v63 = vpop.permute.xlu2 %1085  }
 0x169   :  { %1914 = vst.msk [vmem:[%s4104_s1 + $0x4c4] ss:$8 sm:$0xf0] %vm15_vm0, %v997_v61  }
 0x16a   :  { %1911 = vst.msk [vmem:[%s4104_s1 + $0x484] ss:$8 sm:$0xf] %vm15_vm0, %v988_v62  }
 0x16b   :  { %1912 = vst.msk [vmem:[%s4104_s1 + $0x484] ss:$8 sm:$0xf0] %vm15_vm0, %v988_v62  }
 0x16c   :  { %1933 = vst.msk [vmem:[%s4104_s1 + $0x145] ss:$8 sm:$0xf] %vm15_vm0, %v1086_v63  }
 0x16d   :  { %1399 = vrot.lane.b32.xlu1 %v3272_v24, %s2107_s17  ;;  %1390 = vrot.lane.b32.xlu0 %v3274_v25, %s2107_s17  ;;  %1934 = vst.msk [vmem:[%s4104_s1 + $0x145] ss:$8 sm:$0xf0] %vm15_vm0, %v1086_v63  }
 0x16e   :  { %1408 = vrot.lane.b32.xlu2 %v3284_v26, %s2107_s17  ;;  %1723 = vst.msk [vmem:[%s4104_s1 + $0x500] ss:$8 sm:$0xf] %vm15_vm0, %v3328_v33  }
 0x16f   :  { %v1024_v28 = vpop.permute.xlu1 %1023   ;;  %v1015_v29 = vpop.permute.xlu0 %1014   ;;  %1724 = vst.msk [vmem:[%s4104_s1 + $0x500] ss:$8 sm:$0xf0] %vm15_vm0, %v3328_v33  }
 0x170   :  { %1919 = vst.msk [vmem:[%s4104_s1 + $0x584] ss:$8 sm:$0xf] %vm15_vm0, %v1024_v28   ;;  %v1113_v30 = vpop.permute.xlu2 %1112  }
 0x171   :  { %1920 = vst.msk [vmem:[%s4104_s1 + $0x584] ss:$8 sm:$0xf0] %vm15_vm0, %v1024_v28  }
 0x172   :  { %1917 = vst.msk [vmem:[%s4104_s1 + $0x544] ss:$8 sm:$0xf] %vm15_vm0, %v1015_v29  }
 0x173   :  { %1918 = vst.msk [vmem:[%s4104_s1 + $0x544] ss:$8 sm:$0xf0] %vm15_vm0, %v1015_v29  }
 0x174   :  { %1939 = vst.msk [vmem:[%s4104_s1 + $0x205] ss:$8 sm:$0xf] %vm15_vm0, %v1113_v30  }
 0x175   :  { %1426 = vrot.lane.b32.xlu1 %v3316_v31, %s2107_s17  ;;  %1417 = vrot.lane.b32.xlu0 %v3318_v32, %s2107_s17  ;;  %1940 = vst.msk [vmem:[%s4104_s1 + $0x205] ss:$8 sm:$0xf0] %vm15_vm0, %v1113_v30  }
 0x176   :  { %1435 = vrot.lane.b32.xlu2 %v3328_v33, %s2107_s17  ;;  %1725 = vst.msk [vmem:[%s4104_s1 + $0x540] ss:$8 sm:$0xf] %vm15_vm0, %v3362_v39  }
 0x177   :  { %v1050_v35 = vpop.permute.xlu1 %1049   ;;  %v1041_v36 = vpop.permute.xlu0 %1040   ;;  %1726 = vst.msk [vmem:[%s4104_s1 + $0x540] ss:$8 sm:$0xf0] %vm15_vm0, %v3362_v39  }
 0x178   :  { %1925 = vst.msk [vmem:[%s4104_s1 + $0x45] ss:$8 sm:$0xf] %vm15_vm0, %v1050_v35   ;;  %v1140_v37 = vpop.permute.xlu2 %1139  }
 0x179   :  { %1926 = vst.msk [vmem:[%s4104_s1 + $0x45] ss:$8 sm:$0xf0] %vm15_vm0, %v1050_v35  }
 0x17a   :  { %1923 = vst.msk [vmem:[%s4104_s1 + $0x5] ss:$8 sm:$0xf] %vm15_vm0, %v1041_v36  }
 0x17b   :  { %1924 = vst.msk [vmem:[%s4104_s1 + $0x5] ss:$8 sm:$0xf0] %vm15_vm0, %v1041_v36  }
 0x17c   :  { %1945 = vst.msk [vmem:[%s4104_s1 + $0x2c5] ss:$8 sm:$0xf] %vm15_vm0, %v1140_v37  }
 0x17d   :  { %1453 = vrot.lane.b32.xlu1 %v3360_v38, %s2107_s17  ;;  %1444 = vrot.lane.b32.xlu0 %v3362_v39, %s2107_s17  ;;  %1946 = vst.msk [vmem:[%s4104_s1 + $0x2c5] ss:$8 sm:$0xf0] %vm15_vm0, %v1140_v37  }
 0x17e   :  { %1462 = vrot.lane.b32.xlu2 %v3372_v40, %s2107_s17  ;;  %1727 = vst.msk [vmem:[%s4104_s1 + $0x580] ss:$8 sm:$0xf] %vm15_vm0, %v3360_v38  }
 0x17f   :  { %v1077_v42 = vpop.permute.xlu1 %1076   ;;  %v1068_v0 = vpop.permute.xlu0 %1067   ;;  %1728 = vst.msk [vmem:[%s4104_s1 + $0x580] ss:$8 sm:$0xf0] %vm15_vm0, %v3360_v38  }
 0x180   :  { %1931 = vst.msk [vmem:[%s4104_s1 + $0x105] ss:$8 sm:$0xf] %vm15_vm0, %v1077_v42   ;;  %v1167_v43 = vpop.permute.xlu2 %1166  }
 0x181   :  { %1932 = vst.msk [vmem:[%s4104_s1 + $0x105] ss:$8 sm:$0xf0] %vm15_vm0, %v1077_v42  }
 0x182   :  { %1929 = vst.msk [vmem:[%s4104_s1 + $0xc5] ss:$8 sm:$0xf] %vm15_vm0, %v1068_v0  }
 0x183   :  { %1930 = vst.msk [vmem:[%s4104_s1 + $0xc5] ss:$8 sm:$0xf0] %vm15_vm0, %v1068_v0  }
 0x184   :  { %1951 = vst.msk [vmem:[%s4104_s1 + $0x385] ss:$8 sm:$0xf] %vm15_vm0, %v1167_v43  }
 0x185   :  { %1479 = vrot.lane.b32.xlu1 %v1478_v27, %s2108_s29  ;;  %1470 = vrot.lane.b32.xlu0 %v3246_v60, %s2108_s29  ;;  %1952 = vst.msk [vmem:[%s4104_s1 + $0x385] ss:$8 sm:$0xf0] %vm15_vm0, %v1167_v43  }
 0x186   :  { %1488 = vrot.lane.b32.xlu2 %v3032_v21, %s2108_s29  ;;  %1729 = vst.msk [vmem:[%s4104_s1 + $0x5c0] ss:$8 sm:$0xf] %vm15_vm0, %v3372_v40  }
 0x187   :  { %v1104_v5 = vpop.permute.xlu1 %1103   ;;  %v1095_v45 = vpop.permute.xlu0 %1094   ;;  %1730 = vst.msk [vmem:[%s4104_s1 + $0x5c0] ss:$8 sm:$0xf0] %vm15_vm0, %v3372_v40  }
 0x188   :  { %1937 = vst.msk [vmem:[%s4104_s1 + $0x1c5] ss:$8 sm:$0xf] %vm15_vm0, %v1104_v5   ;;  %v1194_v46 = vpop.permute.xlu2 %1193  }
 0x189   :  { %1938 = vst.msk [vmem:[%s4104_s1 + $0x1c5] ss:$8 sm:$0xf0] %vm15_vm0, %v1104_v5  }
 0x18a   :  { %1935 = vst.msk [vmem:[%s4104_s1 + $0x185] ss:$8 sm:$0xf] %vm15_vm0, %v1095_v45  }
 0x18b   :  { %1936 = vst.msk [vmem:[%s4104_s1 + $0x185] ss:$8 sm:$0xf0] %vm15_vm0, %v1095_v45  }
 0x18c   :  { %1957 = vst.msk [vmem:[%s4104_s1 + $0x445] ss:$8 sm:$0xf] %vm15_vm0, %v1194_v46  }
 0x18d   :  { %1506 = vrot.lane.b32.xlu1 %v1505_v41, %s2108_s29  ;;  %1497 = vrot.lane.b32.xlu0 %v1496_v34, %s2108_s29  ;;  %1958 = vst.msk [vmem:[%s4104_s1 + $0x445] ss:$8 sm:$0xf0] %vm15_vm0, %v1194_v46  }
 0x18e   :  { %1515 = vrot.lane.b32.xlu2 %v3074_v1, %s2108_s29 }
 0x18f   :  { %v1131_v47 = vpop.permute.xlu1 %1130   ;;  %v1122_v48 = vpop.permute.xlu0 %1121  }
 0x190   :  { %1943 = vst.msk [vmem:[%s4104_s1 + $0x285] ss:$8 sm:$0xf] %vm15_vm0, %v1131_v47   ;;  %v1221_v11 = vpop.permute.xlu2 %1220  }
 0x191   :  { %1944 = vst.msk [vmem:[%s4104_s1 + $0x285] ss:$8 sm:$0xf0] %vm15_vm0, %v1131_v47  }
 0x192   :  { %1941 = vst.msk [vmem:[%s4104_s1 + $0x245] ss:$8 sm:$0xf] %vm15_vm0, %v1122_v48  }
 0x193   :  { %1942 = vst.msk [vmem:[%s4104_s1 + $0x245] ss:$8 sm:$0xf0] %vm15_vm0, %v1122_v48  }
 0x194   :  { %1963 = vst.msk [vmem:[%s4104_s1 + $0x505] ss:$8 sm:$0xf] %vm15_vm0, %v1221_v11  }
 0x195   :  { %1533 = vrot.lane.b32.xlu1 %v1532_v8, %s2108_s29  ;;  %1524 = vrot.lane.b32.xlu0 %v1523_v44, %s2108_s29  ;;  %1964 = vst.msk [vmem:[%s4104_s1 + $0x505] ss:$8 sm:$0xf0] %vm15_vm0, %v1221_v11  }
 0x196   :  { %1542 = vrot.lane.b32.xlu2 %v3116_v2, %s2108_s29 }
 0x197   :  { %v1158_v13 = vpop.permute.xlu1 %1157   ;;  %v1149_v14 = vpop.permute.xlu0 %1148  }
 0x198   :  { %1949 = vst.msk [vmem:[%s4104_s1 + $0x345] ss:$8 sm:$0xf] %vm15_vm0, %v1158_v13   ;;  %v1248_v15 = vpop.permute.xlu2 %1247  }
 0x199   :  { %1950 = vst.msk [vmem:[%s4104_s1 + $0x345] ss:$8 sm:$0xf0] %vm15_vm0, %v1158_v13  }
 0x19a   :  { %1947 = vst.msk [vmem:[%s4104_s1 + $0x305] ss:$8 sm:$0xf] %vm15_vm0, %v1149_v14  }
 0x19b   :  { %1948 = vst.msk [vmem:[%s4104_s1 + $0x305] ss:$8 sm:$0xf0] %vm15_vm0, %v1149_v14  }
 0x19c   :  { %1969 = vst.msk [vmem:[%s4104_s1 + $0x5c5] ss:$8 sm:$0xf] %vm15_vm0, %v1248_v15  }
 0x19d   :  { %1560 = vrot.lane.b32.xlu1 %v1559_v16, %s2108_s29  ;;  %1551 = vrot.lane.b32.xlu0 %v1550_v12, %s2108_s29  ;;  %1970 = vst.msk [vmem:[%s4104_s1 + $0x5c5] ss:$8 sm:$0xf0] %vm15_vm0, %v1248_v15  }
 0x19e   :  { %1569 = vrot.lane.b32.xlu2 %v3158_v6, %s2108_s29 }
 0x19f   :  { %v1185_v17 = vpop.permute.xlu1 %1184   ;;  %v1176_v18 = vpop.permute.xlu0 %1175  }
 0x1a0   :  { %1955 = vst.msk [vmem:[%s4104_s1 + $0x405] ss:$8 sm:$0xf] %vm15_vm0, %v1185_v17   ;;  %v1274_v19 = vpop.permute.xlu2 %1273  }
 0x1a1   :  { %1956 = vst.msk [vmem:[%s4104_s1 + $0x405] ss:$8 sm:$0xf0] %vm15_vm0, %v1185_v17  }
 0x1a2   :  { %1953 = vst.msk [vmem:[%s4104_s1 + $0x3c5] ss:$8 sm:$0xf] %vm15_vm0, %v1176_v18  }
 0x1a3   :  { %1954 = vst.msk [vmem:[%s4104_s1 + $0x3c5] ss:$8 sm:$0xf0] %vm15_vm0, %v1176_v18  }
 0x1a4   :  { %1975 = vst.msk [vmem:[%s4104_s1 + $0x86] ss:$8 sm:$0xf] %vm15_vm0, %v1274_v19  }
 0x1a5   :  { %1587 = vrot.lane.b32.xlu1 %v3226_v58, %s2108_s29  ;;  %1578 = vrot.lane.b32.xlu0 %v3196_v9, %s2108_s29  ;;  %1976 = vst.msk [vmem:[%s4104_s1 + $0x86] ss:$8 sm:$0xf0] %vm15_vm0, %v1274_v19  }
 0x1a6   :  { %1596 = vrot.lane.b32.xlu2 %v3236_v59, %s2108_s29 }
 0x1a7   :  { %v1212_v20 = vpop.permute.xlu1 %1211   ;;  %v1203_v21 = vpop.permute.xlu0 %1202  }
 0x1a8   :  { %1961 = vst.msk [vmem:[%s4104_s1 + $0x4c5] ss:$8 sm:$0xf] %vm15_vm0, %v1212_v20   ;;  %v1301_v22 = vpop.permute.xlu2 %1300  }
 0x1a9   :  { %1962 = vst.msk [vmem:[%s4104_s1 + $0x4c5] ss:$8 sm:$0xf0] %vm15_vm0, %v1212_v20  }
 0x1aa   :  { %1959 = vst.msk [vmem:[%s4104_s1 + $0x485] ss:$8 sm:$0xf] %vm15_vm0, %v1203_v21  }
 0x1ab   :  { %1960 = vst.msk [vmem:[%s4104_s1 + $0x485] ss:$8 sm:$0xf0] %vm15_vm0, %v1203_v21  }
 0x1ac   :  { %1981 = vst.msk [vmem:[%s4104_s1 + $0x146] ss:$8 sm:$0xf] %vm15_vm0, %v1301_v22  }
 0x1ad   :  { %1614 = vrot.lane.b32.xlu1 %v3272_v24, %s2108_s29  ;;  %1605 = vrot.lane.b32.xlu0 %v3274_v25, %s2108_s29  ;;  %1982 = vst.msk [vmem:[%s4104_s1 + $0x146] ss:$8 sm:$0xf0] %vm15_vm0, %v1301_v22  }
 0x1ae   :  { %1623 = vrot.lane.b32.xlu2 %v3284_v26, %s2108_s29 }
 0x1af   :  { %v1239_v49 = vpop.permute.xlu1 %1238   ;;  %v1230_v23 = vpop.permute.xlu0 %1229  }
 0x1b0   :  { %1967 = vst.msk [vmem:[%s4104_s1 + $0x585] ss:$8 sm:$0xf] %vm15_vm0, %v1239_v49   ;;  %v1328_v1 = vpop.permute.xlu2 %1327  }
 0x1b1   :  { %1968 = vst.msk [vmem:[%s4104_s1 + $0x585] ss:$8 sm:$0xf0] %vm15_vm0, %v1239_v49  }
 0x1b2   :  { %1965 = vst.msk [vmem:[%s4104_s1 + $0x545] ss:$8 sm:$0xf] %vm15_vm0, %v1230_v23  }
 0x1b3   :  { %1966 = vst.msk [vmem:[%s4104_s1 + $0x545] ss:$8 sm:$0xf0] %vm15_vm0, %v1230_v23  }
 0x1b4   :  { %1987 = vst.msk [vmem:[%s4104_s1 + $0x206] ss:$8 sm:$0xf] %vm15_vm0, %v1328_v1  }
 0x1b5   :  { %1641 = vrot.lane.b32.xlu1 %v3316_v31, %s2108_s29  ;;  %1632 = vrot.lane.b32.xlu0 %v3318_v32, %s2108_s29  ;;  %1988 = vst.msk [vmem:[%s4104_s1 + $0x206] ss:$8 sm:$0xf0] %vm15_vm0, %v1328_v1  }
 0x1b6   :  { %1650 = vrot.lane.b32.xlu2 %v3328_v33, %s2108_s29 }
 0x1b7   :  { %v1265_v4 = vpop.permute.xlu1 %1264   ;;  %v1256_v50 = vpop.permute.xlu0 %1255  }
 0x1b8   :  { %1973 = vst.msk [vmem:[%s4104_s1 + $0x46] ss:$8 sm:$0xf] %vm15_vm0, %v1265_v4   ;;  %v1355_v51 = vpop.permute.xlu2 %1354  }
 0x1b9   :  { %1974 = vst.msk [vmem:[%s4104_s1 + $0x46] ss:$8 sm:$0xf0] %vm15_vm0, %v1265_v4  }
 0x1ba   :  { %1971 = vst.msk [vmem:[%s4104_s1 + $0x6] ss:$8 sm:$0xf] %vm15_vm0, %v1256_v50  }
 0x1bb   :  { %1972 = vst.msk [vmem:[%s4104_s1 + $0x6] ss:$8 sm:$0xf0] %vm15_vm0, %v1256_v50  }
 0x1bc   :  { %1993 = vst.msk [vmem:[%s4104_s1 + $0x2c6] ss:$8 sm:$0xf] %vm15_vm0, %v1355_v51  }
 0x1bd   :  { %1668 = vrot.lane.b32.xlu1 %v3360_v38, %s2108_s29  ;;  %1659 = vrot.lane.b32.xlu0 %v3362_v39, %s2108_s29  ;;  %1994 = vst.msk [vmem:[%s4104_s1 + $0x2c6] ss:$8 sm:$0xf0] %vm15_vm0, %v1355_v51  }
 0x1be   :  { %1677 = vrot.lane.b32.xlu2 %v3372_v40, %s2108_s29 }
 0x1bf   :  { %v1292_v2 = vpop.permute.xlu1 %1291   ;;  %v1283_v3 = vpop.permute.xlu0 %1282  }
 0x1c0   :  { %1979 = vst.msk [vmem:[%s4104_s1 + $0x106] ss:$8 sm:$0xf] %vm15_vm0, %v1292_v2   ;;  %v1382_v52 = vpop.permute.xlu2 %1381  }
 0x1c1   :  { %1980 = vst.msk [vmem:[%s4104_s1 + $0x106] ss:$8 sm:$0xf0] %vm15_vm0, %v1292_v2  }
 0x1c2   :  { %1977 = vst.msk [vmem:[%s4104_s1 + $0xc6] ss:$8 sm:$0xf] %vm15_vm0, %v1283_v3  }
 0x1c3   :  { %1978 = vst.msk [vmem:[%s4104_s1 + $0xc6] ss:$8 sm:$0xf0] %vm15_vm0, %v1283_v3  }
 0x1c4   :  { %1999 = vst.msk [vmem:[%s4104_s1 + $0x386] ss:$8 sm:$0xf] %vm15_vm0, %v1382_v52  }
 0x1c5   :  { %2000 = vst.msk [vmem:[%s4104_s1 + $0x386] ss:$8 sm:$0xf0] %vm15_vm0, %v1382_v52  }
 0x1c7   :  { %v1319_v53 = vpop.permute.xlu1 %1318   ;;  %v1310_v6 = vpop.permute.xlu0 %1309  }
 0x1c8   :  { %1985 = vst.msk [vmem:[%s4104_s1 + $0x1c6] ss:$8 sm:$0xf] %vm15_vm0, %v1319_v53   ;;  %v1409_v7 = vpop.permute.xlu2 %1408  }
 0x1c9   :  { %1986 = vst.msk [vmem:[%s4104_s1 + $0x1c6] ss:$8 sm:$0xf0] %vm15_vm0, %v1319_v53  }
 0x1ca   :  { %1983 = vst.msk [vmem:[%s4104_s1 + $0x186] ss:$8 sm:$0xf] %vm15_vm0, %v1310_v6  }
 0x1cb   :  { %1984 = vst.msk [vmem:[%s4104_s1 + $0x186] ss:$8 sm:$0xf0] %vm15_vm0, %v1310_v6  }
 0x1cc   :  { %2005 = vst.msk [vmem:[%s4104_s1 + $0x446] ss:$8 sm:$0xf] %vm15_vm0, %v1409_v7  }
 0x1cd   :  { %2006 = vst.msk [vmem:[%s4104_s1 + $0x446] ss:$8 sm:$0xf0] %vm15_vm0, %v1409_v7  }
 0x1cf   :  { %v1346_v54 = vpop.permute.xlu1 %1345   ;;  %v1337_v55 = vpop.permute.xlu0 %1336  }
 0x1d0   :  { %1991 = vst.msk [vmem:[%s4104_s1 + $0x286] ss:$8 sm:$0xf] %vm15_vm0, %v1346_v54   ;;  %v1436_v9 = vpop.permute.xlu2 %1435  }
 0x1d1   :  { %1992 = vst.msk [vmem:[%s4104_s1 + $0x286] ss:$8 sm:$0xf0] %vm15_vm0, %v1346_v54  }
 0x1d2   :  { %1989 = vst.msk [vmem:[%s4104_s1 + $0x246] ss:$8 sm:$0xf] %vm15_vm0, %v1337_v55  }
 0x1d3   :  { %1990 = vst.msk [vmem:[%s4104_s1 + $0x246] ss:$8 sm:$0xf0] %vm15_vm0, %v1337_v55  }
 0x1d4   :  { %2011 = vst.msk [vmem:[%s4104_s1 + $0x506] ss:$8 sm:$0xf] %vm15_vm0, %v1436_v9  }
 0x1d5   :  { %2012 = vst.msk [vmem:[%s4104_s1 + $0x506] ss:$8 sm:$0xf0] %vm15_vm0, %v1436_v9  }
 0x1d7   :  { %v1373_v10 = vpop.permute.xlu1 %1372   ;;  %v1364_v56 = vpop.permute.xlu0 %1363  }
 0x1d8   :  { %1997 = vst.msk [vmem:[%s4104_s1 + $0x346] ss:$8 sm:$0xf] %vm15_vm0, %v1373_v10   ;;  %v1463_v57 = vpop.permute.xlu2 %1462  }
 0x1d9   :  { %1998 = vst.msk [vmem:[%s4104_s1 + $0x346] ss:$8 sm:$0xf0] %vm15_vm0, %v1373_v10  }
 0x1da   :  { %1995 = vst.msk [vmem:[%s4104_s1 + $0x306] ss:$8 sm:$0xf] %vm15_vm0, %v1364_v56  }
 0x1db   :  { %1996 = vst.msk [vmem:[%s4104_s1 + $0x306] ss:$8 sm:$0xf0] %vm15_vm0, %v1364_v56  }
 0x1dc   :  { %2017 = vst.msk [vmem:[%s4104_s1 + $0x5c6] ss:$8 sm:$0xf] %vm15_vm0, %v1463_v57  }
 0x1dd   :  { %2018 = vst.msk [vmem:[%s4104_s1 + $0x5c6] ss:$8 sm:$0xf0] %vm15_vm0, %v1463_v57  }
 0x1df   :  { %v1400_v58 = vpop.permute.xlu1 %1399   ;;  %v1391_v59 = vpop.permute.xlu0 %1390  }
 0x1e0   :  { %2003 = vst.msk [vmem:[%s4104_s1 + $0x406] ss:$8 sm:$0xf] %vm15_vm0, %v1400_v58   ;;  %v1489_v60 = vpop.permute.xlu2 %1488  }
 0x1e1   :  { %2004 = vst.msk [vmem:[%s4104_s1 + $0x406] ss:$8 sm:$0xf0] %vm15_vm0, %v1400_v58  }
 0x1e2   :  { %2001 = vst.msk [vmem:[%s4104_s1 + $0x3c6] ss:$8 sm:$0xf] %vm15_vm0, %v1391_v59  }
 0x1e3   :  { %2002 = vst.msk [vmem:[%s4104_s1 + $0x3c6] ss:$8 sm:$0xf0] %vm15_vm0, %v1391_v59  }
 0x1e4   :  { %2023 = vst.msk [vmem:[%s4104_s1 + $0x87] ss:$8 sm:$0xf] %vm15_vm0, %v1489_v60  }
 0x1e5   :  { %2024 = vst.msk [vmem:[%s4104_s1 + $0x87] ss:$8 sm:$0xf0] %vm15_vm0, %v1489_v60  }
 0x1e7   :  { %v1427_v61 = vpop.permute.xlu1 %1426   ;;  %v1418_v62 = vpop.permute.xlu0 %1417  }
 0x1e8   :  { %2009 = vst.msk [vmem:[%s4104_s1 + $0x4c6] ss:$8 sm:$0xf] %vm15_vm0, %v1427_v61   ;;  %v1516_v63 = vpop.permute.xlu2 %1515  }
 0x1e9   :  { %2010 = vst.msk [vmem:[%s4104_s1 + $0x4c6] ss:$8 sm:$0xf0] %vm15_vm0, %v1427_v61  }
 0x1ea   :  { %2007 = vst.msk [vmem:[%s4104_s1 + $0x486] ss:$8 sm:$0xf] %vm15_vm0, %v1418_v62  }
 0x1eb   :  { %2008 = vst.msk [vmem:[%s4104_s1 + $0x486] ss:$8 sm:$0xf0] %vm15_vm0, %v1418_v62  }
 0x1ec   :  { %2029 = vst.msk [vmem:[%s4104_s1 + $0x147] ss:$8 sm:$0xf] %vm15_vm0, %v1516_v63  }
 0x1ed   :  { %2030 = vst.msk [vmem:[%s4104_s1 + $0x147] ss:$8 sm:$0xf0] %vm15_vm0, %v1516_v63  }
 0x1ef   :  { %v1454_v24 = vpop.permute.xlu1 %1453   ;;  %v1445_v25 = vpop.permute.xlu0 %1444  }
 0x1f0   :  { %2015 = vst.msk [vmem:[%s4104_s1 + $0x586] ss:$8 sm:$0xf] %vm15_vm0, %v1454_v24   ;;  %v1543_v26 = vpop.permute.xlu2 %1542  }
 0x1f1   :  { %2016 = vst.msk [vmem:[%s4104_s1 + $0x586] ss:$8 sm:$0xf0] %vm15_vm0, %v1454_v24  }
 0x1f2   :  { %2013 = vst.msk [vmem:[%s4104_s1 + $0x546] ss:$8 sm:$0xf] %vm15_vm0, %v1445_v25  }
 0x1f3   :  { %2014 = vst.msk [vmem:[%s4104_s1 + $0x546] ss:$8 sm:$0xf0] %vm15_vm0, %v1445_v25  }
 0x1f4   :  { %2035 = vst.msk [vmem:[%s4104_s1 + $0x207] ss:$8 sm:$0xf] %vm15_vm0, %v1543_v26  }
 0x1f5   :  { %2036 = vst.msk [vmem:[%s4104_s1 + $0x207] ss:$8 sm:$0xf0] %vm15_vm0, %v1543_v26  }
 0x1f7   :  { %v1480_v27 = vpop.permute.xlu1 %1479   ;;  %v1471_v28 = vpop.permute.xlu0 %1470  }
 0x1f8   :  { %2021 = vst.msk [vmem:[%s4104_s1 + $0x47] ss:$8 sm:$0xf] %vm15_vm0, %v1480_v27   ;;  %v1570_v29 = vpop.permute.xlu2 %1569  }
 0x1f9   :  { %2022 = vst.msk [vmem:[%s4104_s1 + $0x47] ss:$8 sm:$0xf0] %vm15_vm0, %v1480_v27  }
 0x1fa   :  { %2019 = vst.msk [vmem:[%s4104_s1 + $0x7] ss:$8 sm:$0xf] %vm15_vm0, %v1471_v28  }
 0x1fb   :  { %2020 = vst.msk [vmem:[%s4104_s1 + $0x7] ss:$8 sm:$0xf0] %vm15_vm0, %v1471_v28  }
 0x1fc   :  { %2041 = vst.msk [vmem:[%s4104_s1 + $0x2c7] ss:$8 sm:$0xf] %vm15_vm0, %v1570_v29  }
 0x1fd   :  { %2042 = vst.msk [vmem:[%s4104_s1 + $0x2c7] ss:$8 sm:$0xf0] %vm15_vm0, %v1570_v29  }
 0x1ff   :  { %v1507_v30 = vpop.permute.xlu1 %1506   ;;  %v1498_v31 = vpop.permute.xlu0 %1497  }
 0x200   :  { %2027 = vst.msk [vmem:[%s4104_s1 + $0x107] ss:$8 sm:$0xf] %vm15_vm0, %v1507_v30   ;;  %v1597_v32 = vpop.permute.xlu2 %1596  }
 0x201   :  { %2028 = vst.msk [vmem:[%s4104_s1 + $0x107] ss:$8 sm:$0xf0] %vm15_vm0, %v1507_v30  }
 0x202   :  { %2025 = vst.msk [vmem:[%s4104_s1 + $0xc7] ss:$8 sm:$0xf] %vm15_vm0, %v1498_v31  }
 0x203   :  { %2026 = vst.msk [vmem:[%s4104_s1 + $0xc7] ss:$8 sm:$0xf0] %vm15_vm0, %v1498_v31  }
 0x204   :  { %2047 = vst.msk [vmem:[%s4104_s1 + $0x387] ss:$8 sm:$0xf] %vm15_vm0, %v1597_v32  }
 0x205   :  { %2048 = vst.msk [vmem:[%s4104_s1 + $0x387] ss:$8 sm:$0xf0] %vm15_vm0, %v1597_v32  }
 0x207   :  { %v1534_v33 = vpop.permute.xlu1 %1533   ;;  %v1525_v34 = vpop.permute.xlu0 %1524  }
 0x208   :  { %2033 = vst.msk [vmem:[%s4104_s1 + $0x1c7] ss:$8 sm:$0xf] %vm15_vm0, %v1534_v33   ;;  %v1624_v35 = vpop.permute.xlu2 %1623  }
 0x209   :  { %2034 = vst.msk [vmem:[%s4104_s1 + $0x1c7] ss:$8 sm:$0xf0] %vm15_vm0, %v1534_v33  }
 0x20a   :  { %2031 = vst.msk [vmem:[%s4104_s1 + $0x187] ss:$8 sm:$0xf] %vm15_vm0, %v1525_v34  }
 0x20b   :  { %2032 = vst.msk [vmem:[%s4104_s1 + $0x187] ss:$8 sm:$0xf0] %vm15_vm0, %v1525_v34  }
 0x20c   :  { %2053 = vst.msk [vmem:[%s4104_s1 + $0x447] ss:$8 sm:$0xf] %vm15_vm0, %v1624_v35  }
 0x20d   :  { %2054 = vst.msk [vmem:[%s4104_s1 + $0x447] ss:$8 sm:$0xf0] %vm15_vm0, %v1624_v35  }
 0x20f   :  { %v1561_v36 = vpop.permute.xlu1 %1560   ;;  %v1552_v37 = vpop.permute.xlu0 %1551  }
 0x210   :  { %2039 = vst.msk [vmem:[%s4104_s1 + $0x287] ss:$8 sm:$0xf] %vm15_vm0, %v1561_v36   ;;  %v1651_v38 = vpop.permute.xlu2 %1650  }
 0x211   :  { %2040 = vst.msk [vmem:[%s4104_s1 + $0x287] ss:$8 sm:$0xf0] %vm15_vm0, %v1561_v36  }
 0x212   :  { %2037 = vst.msk [vmem:[%s4104_s1 + $0x247] ss:$8 sm:$0xf] %vm15_vm0, %v1552_v37  }
 0x213   :  { %2038 = vst.msk [vmem:[%s4104_s1 + $0x247] ss:$8 sm:$0xf0] %vm15_vm0, %v1552_v37  }
 0x214   :  { %2059 = vst.msk [vmem:[%s4104_s1 + $0x507] ss:$8 sm:$0xf] %vm15_vm0, %v1651_v38  }
 0x215   :  { %2060 = vst.msk [vmem:[%s4104_s1 + $0x507] ss:$8 sm:$0xf0] %vm15_vm0, %v1651_v38  }
 0x217   :  { %v1588_v39 = vpop.permute.xlu1 %1587   ;;  %v1579_v40 = vpop.permute.xlu0 %1578  }
 0x218   :  { %2045 = vst.msk [vmem:[%s4104_s1 + $0x347] ss:$8 sm:$0xf] %vm15_vm0, %v1588_v39   ;;  %v1678_v41 = vpop.permute.xlu2 %1677  }
 0x219   :  { %2046 = vst.msk [vmem:[%s4104_s1 + $0x347] ss:$8 sm:$0xf0] %vm15_vm0, %v1588_v39  }
 0x21a   :  { %2043 = vst.msk [vmem:[%s4104_s1 + $0x307] ss:$8 sm:$0xf] %vm15_vm0, %v1579_v40  }
 0x21b   :  { %2044 = vst.msk [vmem:[%s4104_s1 + $0x307] ss:$8 sm:$0xf0] %vm15_vm0, %v1579_v40  }
 0x21c   :  { %2065 = vst.msk [vmem:[%s4104_s1 + $0x5c7] ss:$8 sm:$0xf] %vm15_vm0, %v1678_v41  }
 0x21d   :  { %2066 = vst.msk [vmem:[%s4104_s1 + $0x5c7] ss:$8 sm:$0xf0] %vm15_vm0, %v1678_v41  }
 0x21f   :  { %v1615_v42 = vpop.permute.xlu1 %1614   ;;  %v1606_v0 = vpop.permute.xlu0 %1605  }
 0x220   :  { %2051 = vst.msk [vmem:[%s4104_s1 + $0x407] ss:$8 sm:$0xf] %vm15_vm0, %v1615_v42  }
 0x221   :  { %2052 = vst.msk [vmem:[%s4104_s1 + $0x407] ss:$8 sm:$0xf0] %vm15_vm0, %v1615_v42  }
 0x222   :  { %2049 = vst.msk [vmem:[%s4104_s1 + $0x3c7] ss:$8 sm:$0xf] %vm15_vm0, %v1606_v0  }
 0x223   :  { %2050 = vst.msk [vmem:[%s4104_s1 + $0x3c7] ss:$8 sm:$0xf0] %vm15_vm0, %v1606_v0  }
 0x227   :  { %v1642_v43 = vpop.permute.xlu1 %1641   ;;  %v1633_v44 = vpop.permute.xlu0 %1632  }
 0x228   :  { %2057 = vst.msk [vmem:[%s4104_s1 + $0x4c7] ss:$8 sm:$0xf] %vm15_vm0, %v1642_v43  }
 0x229   :  { %2058 = vst.msk [vmem:[%s4104_s1 + $0x4c7] ss:$8 sm:$0xf0] %vm15_vm0, %v1642_v43  }
 0x22a   :  { %2055 = vst.msk [vmem:[%s4104_s1 + $0x487] ss:$8 sm:$0xf] %vm15_vm0, %v1633_v44  }
 0x22b   :  { %2056 = vst.msk [vmem:[%s4104_s1 + $0x487] ss:$8 sm:$0xf0] %vm15_vm0, %v1633_v44  }
 0x22f   :  { %v1669_v5 = vpop.permute.xlu1 %1668   ;;  %v1660_v45 = vpop.permute.xlu0 %1659  }
 0x230   :  { %2063 = vst.msk [vmem:[%s4104_s1 + $0x587] ss:$8 sm:$0xf] %vm15_vm0, %v1669_v5  }
 0x231   :  { %2064 = vst.msk [vmem:[%s4104_s1 + $0x587] ss:$8 sm:$0xf0] %vm15_vm0, %v1669_v5  }
 0x232   :  { %2061 = vst.msk [vmem:[%s4104_s1 + $0x547] ss:$8 sm:$0xf] %vm15_vm0, %v1660_v45  }
 0x233   :  { %2062 = vst.msk [vmem:[%s4104_s1 + $0x547] ss:$8 sm:$0xf0] %vm15_vm0, %v1660_v45  }
 0x234   :  { %1684 = vsyncpa [#allocation1], 1 }

// kernel: gated_attention_mil_forward.2
= control target key start
LH: loop header
LB: loop body
LE: loop exit
PB: predicated region body
PF: predicated region fallthrough
CT: control target
= control target key end

     0   :  { %s764_s12 = smov 0   ;;  %s766_s13 = smov 0   ;;  %s874_s0 = inlined_call_operand.vmem [shape: f32[32,768], index: 0, kind: input, shape index: {}]   ;;  %s875_s1 = inlined_call_operand.vmem [shape: bf16[768,128], index: 1, kind: input, shape index: {}]   ;;  %s876_s2 = inlined_call_operand.vmem [shape: f32[1,128], index: 2, kind: input, shape index: {}]   ;;  %s877_s3 = inlined_call_operand.vmem [shape: f32[32,128], index: 3, kind: output, shape index: {}]  }
   0x1   :  { %s768_s14 = smov 0   ;;  %s770_s15 = smov 0  }
   0x2   :  { %s772_s16 = smov 0  }
   0x3 LB: > { %s22_s17 = sadd.s32 1, %s737_s15  ;;  %p41_p1 = scmp.ne.s32.totalorder %s729_s13, %s725_s12  ;;  %s741_s16 = sphi %s772_s16, %s13_s16   ;;  %s737_s15 = sphi %s770_s15, %s881_s15   ;;  %s733_s14 = sphi %s768_s14, %s880_s14   ;;  %s729_s13 = sphi %s766_s13, %s879_s13   ;;  %s725_s12 = sphi %s764_s12, %s878_s12  }
   0x4   : > { %p23_p0 = scmp.ge.s32.totalorder %s22_s17, 3  ;;  %p42_p2 = scmp.eq.s32.totalorder %s741_s16, 0 }
   0x5   : > { %s34_s19 = sadd.s32 1, %s729_s13  ;;  %p550_p5 = scmp.ge.s32.totalorder %s741_s16, 3 }
   0x6   : > { %s883_s17 = smov (%p23_p0, %s22_s17), 0  ;;  %p43_p3 = por %p42_p2, %p41_p1 }
   0x7   : > { %s30_s18 = ssub.s32 %s737_s15, %s883_s17  ;;  %143 = sbr.rel (%p550_p5) target bundleno = 24 (0x18), region = 20 }
   0x8   : > { %p32_p4 = scmp.eq.s32.totalorder %s30_s18, 0 }
   0xa   : > { %s799_s20 = scalar_select %p32_p4, %s729_s13, %s34_s19  }
   0xc   : > { %146 = sbr.rel (!%p43_p3) target bundleno = 24 (0x18), region = 24  ;;  %s148_s21 = sand.u32 (%p43_p3), 1, %s729_s13  }
   0xd   : > { %s628_s22 = sshll.u32 (%p43_p3), %s737_s15, 4  ;;  %s551_s23 = sshll.u32 (%p43_p3), %s148_s21, 6 }
   0xe   : > { %s156_s26 = scalar_lea.vmem (%p43_p3), %s874_s0, %s628_s22  ;;  %s150_s27 = scalar_lea.vmem (%p43_p3), [#allocation3], %s551_s23 }
   0xf   : > { %v169_v0 = vld [vmem:[%s156_s26] sm:$0xff] (%p43_p3)  ;;  %v171_v1 = vld [vmem:[%s156_s26 + $0x8] sm:$0xff] (%p43_p3)  ;;  %v173_v2 = vld [vmem:[%s156_s26 + $0x30] sm:$0xff] (%p43_p3) }
  0x10   : > { %170 = vst [vmem:[%s150_s27] sm:$0xff] (%p43_p3), %v169_v0  ;;  %v175_v3 = vld [vmem:[%s156_s26 + $0x38] sm:$0xff] (%p43_p3)  ;;  %v177_v4 = vld [vmem:[%s156_s26 + $0x60] sm:$0xff] (%p43_p3)  ;;  %v179_v5 = vld [vmem:[%s156_s26 + $0x68] sm:$0xff] (%p43_p3) }
  0x11   : > { %172 = vst [vmem:[%s150_s27 + $0x8] sm:$0xff] %v171_v1  ;;  %v181_v6 = vld [vmem:[%s156_s26 + $0x90] sm:$0xff]  ;;  %v183_v7 = vld [vmem:[%s156_s26 + $0x98] sm:$0xff] }
  0x12   : > { %174 = vst [vmem:[%s150_s27 + $0x10] sm:$0xff] %v173_v2 }
  0x13   : > { %176 = vst [vmem:[%s150_s27 + $0x18] sm:$0xff] %v175_v3 }
  0x14   : > { %178 = vst [vmem:[%s150_s27 + $0x20] sm:$0xff] %v177_v4 }
  0x15   : > { %180 = vst [vmem:[%s150_s27 + $0x28] sm:$0xff] %v179_v5 }
  0x16   : > { %182 = vst [vmem:[%s150_s27 + $0x30] sm:$0xff] %v181_v6 }
  0x17   : > { %184 = vst [vmem:[%s150_s27 + $0x38] sm:$0xff] %v183_v7 }
  0x18 PF: > { %p554_p6 = scmp.ge.s32.totalorder %s741_s16, 1  ;;  %p198_p7 = scmp.lt.s32.totalorder %s741_s16, 4 }
  0x1a   : > { %p199_p8 = pnand %p554_p6, %p198_p7 }
  0x1b   : > { %s205_s28 = sand.u32 (!%p199_p8), 1, %s725_s12   ;;  %s556_s29 = sshll.u32 (!%p199_p8), %s733_s14, 5 }
  0x1c   : > { %202 = sbr.rel (%p199_p8) target bundleno = 231 (0xe7), region = 51  ;;  %s555_s30 = sshll.u32 (!%p199_p8), %s205_s28, 6 }
  0x1d   : > { %p236_p9 = scmp.lt.s32.totalorder (!%p199_p8), %s556_s29, 95  ;;  %s816_s8 = scalar_lea.vmem (!%p199_p8), [#allocation3], %s555_s30 }
  0x1e   : > { %p558_p10 = scmp.ne.s32.totalorder (!%p199_p8), %s733_s14, 0 }
  0x21   : > { %s885_s29 = smov (!%p236_p9, %s556_s29), 95  ;;  %250 = sbr.rel (%p558_p10) target bundleno = 43 (0x2b), region = 59 }
  0x22   : > { %s557_s4 = sshll.u32 %s885_s29, 2 }
  0x23   : > { %s814_s7 = scalar_lea.vmem %s875_s1, %s557_s4 }
  0x26   : > { %v743_v8 = vmov 0.0  }
  0x27   : > { %251 = vst [vmem:[#allocation2 + $0x10] sm:$0xff] %v743_v8 }
  0x28   : > { %252 = vst [vmem:[#allocation2] sm:$0xff] %v743_v8 }
  0x29   : > { %253 = vst [vmem:[#allocation2 + $0x18] sm:$0xff] %v743_v8 }
  0x2a   : > { %254 = vst [vmem:[#allocation2 + $0x8] sm:$0xff] %v743_v8 }
  0x2b PF: > { %v636_v9 = vld [vmem:[%s814_s7 + $0x38] sm:$0xff]  ;;  %v635_v11 = vld [vmem:[%s814_s7 + $0x30] sm:$0xff]  ;;  %v634_v13 = vld [vmem:[%s814_s7 + $0x28] sm:$0xff]  ;;  %p623_p11 = scmp.ne.s32.totalorder %s733_s14, 2 }
  0x2c   : > { %v644_v10 = vld [vmem:[%s814_s7 + $0x78] sm:$0xff]  ;;  %399 = vmatpush.bf16.msra.mxu0 %v636_v9  ;;  %645 = vmatpush.bf16.msra.mxu2 %v636_v9  ;;  %v643_v12 = vld [vmem:[%s814_s7 + $0x70] sm:$0xff]  ;;  %v642_v14 = vld [vmem:[%s814_s7 + $0x68] sm:$0xff] }
  0x2d   : > { %418 = vmatpush.bf16.msra.mxu1 %v644_v10  ;;  %653 = vmatpush.bf16.msra.mxu3 %v644_v10  ;;  %v633_v15 = vld [vmem:[%s814_s7 + $0x20] sm:$0xff]  ;;  %v632_v17 = vld [vmem:[%s814_s7 + $0x18] sm:$0xff]  ;;  %v631_v19 = vld [vmem:[%s814_s7 + $0x10] sm:$0xff] }
  0x2e   : > { %v641_v16 = vld [vmem:[%s814_s7 + $0x60] sm:$0xff]  ;;  %v640_v18 = vld [vmem:[%s814_s7 + $0x58] sm:$0xff]  ;;  %v639_v20 = vld [vmem:[%s814_s7 + $0x50] sm:$0xff] }
  0x2f   : > { %v630_v21 = vld [vmem:[%s814_s7 + $0x8] sm:$0xff]  ;;  %v629_v23 = vld [vmem:[%s814_s7] sm:$0xff]  ;;  %v261_v26 = vld [vmem:[%s816_s8 + $0x10] sm:$0xff] }
  0x30   : > { %400 = vmatpush.bf16.msra.mxu0 %v635_v11  ;;  %646 = vmatpush.bf16.msra.mxu2 %v635_v11  ;;  %v638_v22 = vld [vmem:[%s814_s7 + $0x48] sm:$0xff]  ;;  %v637_v24 = vld [vmem:[%s814_s7 + $0x40] sm:$0xff]  ;;  %v265_v28 = vld [vmem:[%s816_s8 + $0x30] sm:$0xff] }
  0x31   : > { %419 = vmatpush.bf16.msra.mxu1 %v643_v12  ;;  %654 = vmatpush.bf16.msra.mxu3 %v643_v12  ;;  %v259_v25 = vld [vmem:[%s816_s8] sm:$0xff]  ;;  %v260_v29 = vld [vmem:[%s816_s8 + $0x8] sm:$0xff]  ;;  %v262_v30 = vld [vmem:[%s816_s8 + $0x18] sm:$0xff] }
  0x32   : > { %v263_v27 = vld [vmem:[%s816_s8 + $0x20] sm:$0xff]  ;;  %v264_v31 = vld [vmem:[%s816_s8 + $0x28] sm:$0xff]  ;;  %v266_v32 = vld [vmem:[%s816_s8 + $0x38] sm:$0xff]  ;;  %v267_v33 = vpack.c.bf16 %v261_v26, %v259_v25  ;;  %v268_v35 = vpack.c.bf16 %v262_v30, %v260_v29 }
  0x33   : > { %v269_v34 = vpack.c.bf16 %v265_v28, %v263_v27  ;;  %v270_v36 = vpack.c.bf16 %v266_v32, %v264_v31  ;;  %v255_v38 = vld [vmem:[#allocation2 + $0x10] sm:$0xff]  ;;  %v257_v43 = vld [vmem:[#allocation2 + $0x18] sm:$0xff]  ;;  %v256_v47 = vld [vmem:[#allocation2] sm:$0xff] }
  0x34   : > { %401 = vmatpush.bf16.msra.mxu0 %v634_v13  ;;  %647 = vmatpush.bf16.msra.mxu2 %v634_v13  ;;  %v258_v53 = vld [vmem:[#allocation2 + $0x8] sm:$0xff] }
  0x35   : > { %420 = vmatpush.bf16.msra.mxu1 %v642_v14  ;;  %655 = vmatpush.bf16.msra.mxu3 %v642_v14 }
  0x38   : > { %402 = vmatpush.bf16.msra.mxu0 %v633_v15  ;;  %648 = vmatpush.bf16.msra.mxu2 %v633_v15 }
  0x39   : > { %421 = vmatpush.bf16.msra.mxu1 %v641_v16  ;;  %656 = vmatpush.bf16.msra.mxu3 %v641_v16 }
  0x3c   : > { %403 = vmatpush.bf16.msra.mxu0 %v632_v17  ;;  %649 = vmatpush.bf16.msra.mxu2 %v632_v17 }
  0x3d   : > { %422 = vmatpush.bf16.msra.mxu1 %v640_v18  ;;  %657 = vmatpush.bf16.msra.mxu3 %v640_v18 }
  0x40   : > { %404 = vmatpush.bf16.msra.mxu0 %v631_v19  ;;  %650 = vmatpush.bf16.msra.mxu2 %v631_v19 }
  0x41   : > { %423 = vmatpush.bf16.msra.mxu1 %v639_v20  ;;  %658 = vmatpush.bf16.msra.mxu3 %v639_v20 }
  0x44   : > { %405 = vmatpush.bf16.msra.mxu0 %v630_v21  ;;  %651 = vmatpush.bf16.msra.mxu2 %v630_v21 }
  0x45   : > { %424 = vmatpush.bf16.msra.mxu1 %v638_v22  ;;  %659 = vmatpush.bf16.msra.mxu3 %v638_v22 }
  0x48   : > { %406 = vmatpush.bf16.msra.mxu0 %v629_v23  ;;  %652 = vmatpush.bf16.msra.mxu2 %v629_v23 }
  0x49   : > { %425 = vmatpush.bf16.msra.mxu1 %v637_v24  ;;  %660 = vmatpush.bf16.msra.mxu3 %v637_v24 }
  0x4b   : > { %407 = vmatmul.bf16.vlgmr.msra.gmra.mxu0 %v267_v33  ;;  %412 = vmatmul.bf16.vlgmr.msra.gmra.mxu2 %v269_v34 }
  0x4c   : > { %426 = vmatmul.bf16.vlgmr.msra.gmra.mxu1 %v268_v35  ;;  %431 = vmatmul.bf16.vlgmr.msra.gmra.mxu3 %v270_v36 }
  0xc8   : > { %v408_v37 = vpop.f32.mrf.mxu0 }
  0xc9   : > { %v427_v39 = vpop.f32.mrf.mxu1 }
  0xca   : > { %v428_v40 = vadd.f32 %v427_v39, %v408_v37 }
  0xcc   : > { %v437_v41 = vadd.f32 %v428_v40, %v255_v38 }
  0xce   : > { %441 = vst [vmem:[#allocation2 + $0x10] sm:$0xff] %v437_v41  ;;  %v413_v42 = vpop.f32.mrf.mxu2 }
  0xcf   : > { %v432_v44 = vpop.f32.mrf.mxu3 }
  0xd0   : > { %v433_v45 = vadd.f32 %v432_v44, %v413_v42  ;;  %v410_v46 = vpop.f32.mrf.mxu0 }
  0xd1   : > { %v429_v48 = vpop.f32.mrf.mxu1 }
  0xd2   : > { %v439_v49 = vadd.f32 %v433_v45, %v257_v43  ;;  %v430_v50 = vadd.f32 %v429_v48, %v410_v46 }
  0xd4   : > { %443 = vst [vmem:[#allocation2 + $0x18] sm:$0xff] %v439_v49  ;;  %v438_v51 = vadd.f32 %v430_v50, %v256_v47 }
  0xd6   : > { %442 = vst [vmem:[#allocation2] sm:$0xff] %v438_v51  ;;  %v415_v52 = vpop.f32.mrf.mxu2 }
  0xd7   : > { %v434_v54 = vpop.f32.mrf.mxu3 }
  0xd8   : > { %v435_v55 = vadd.f32 %v434_v54, %v415_v52  ;;  %448 = sbr.rel (%p623_p11) target bundleno = 231 (0xe7), region = 63 }
  0xda   : > { %v440_v56 = vadd.f32 %v435_v55, %v258_v53 }
  0xdc   : > { %444 = vst [vmem:[#allocation2 + $0x8] sm:$0xff] %v440_v56 }
  0xdd   : > { %v449_v57 = vld [vmem:[#allocation2 + $0x10] sm:$0xff]  ;;  %v702_v58 = vld [vmem:[%s876_s2] ss:$0 sm:$0xff]  ;;  %v451_v60 = vld [vmem:[#allocation2 + $0x18] sm:$0xff] }
  0xde   : > { %v450_v59 = vld [vmem:[#allocation2] sm:$0xff]  ;;  %v457_v62 = vadd.f32 %v702_v58, %v449_v57  ;;  %v459_v0 = vadd.f32 %v702_v58, %v451_v60 }
  0xdf   : > { %v458_v63 = vadd.f32 %v702_v58, %v450_v59 }
  0xe0   : > { %461 = vst [vmem:[%s877_s3] sm:$0xff] %v457_v62 }
  0xe1   : > { %462 = vst [vmem:[%s877_s3 + $0x8] sm:$0xff] %v458_v63 }
  0xe2   : > { %463 = vst [vmem:[%s877_s3 + $0x10] sm:$0xff] %v459_v0 }
  0xe3   : > { %v452_v61 = vld [vmem:[#allocation2 + $0x8] sm:$0xff] }
  0xe4   : > { %v460_v1 = vadd.f32 %v702_v58, %v452_v61 }
  0xe6   : > { %464 = vst [vmem:[%s877_s3 + $0x18] sm:$0xff] %v460_v1 }
  0xe7 PF: > { %s13_s16 = sadd.s32 1, %s741_s16   ;;  %s878_s12 = smov %s729_s13 }
  0xe8   : > { %p10_p12 = scmp.ge.s32.totalorder %s13_s16, 5   ;;  %s879_s13 = smov %s799_s20 }
  0xe9   : > { %s880_s14 = smov %s737_s15  ;;  %s881_s15 = smov %s883_s17 }
  0xea   :  { %12 = sbr.rel (!%p10_p12) target bundleno = 3 (0x3), region = 101 }

// kernel: gated_attention_mil_forward.3
= control target key start
LH: loop header
LB: loop body
LE: loop exit
PB: predicated region body
PF: predicated region fallthrough
CT: control target
= control target key end

     0   :  { %s703_s0 = inlined_call_operand.vmem [shape: f32[32,128], index: 0, kind: input, shape index: {}]   ;;  %s704_s1 = inlined_call_operand.vmem [shape: bf16[128,64], index: 1, kind: input, shape index: {}]   ;;  %s705_s2 = inlined_call_operand.vmem [shape: f32[1,64], index: 2, kind: input, shape index: {}]   ;;  %s706_s3 = inlined_call_operand.vmem [shape: bf16[1,32], index: 3, kind: input, shape index: {}]   ;;  %s707_s4 = inlined_call_operand.<no memory space> [shape: f32[1,1], index: 4, kind: input, shape index: {}]   ;;  %s708_s5 = inlined_call_operand.vmem [shape: f32[128,1], index: 5, kind: input, shape index: {}]   ;;  %s709_s7 = inlined_call_operand.hbm [shape: f32[1,1], index: 7, kind: output, shape index: {0}]   ;;  %s710_s8 = inlined_call_operand.hbm [shape: f32[1,32], index: 8, kind: output, shape index: {1}]   ;;  %s711_s6 = inlined_call_operand.<no memory space> [shape: f32[1,1], index: 6, kind: input, shape index: {}]  }
   0x1   :  { %v14_v0 = vstv %s707_s4  ;;  %v16_v1 = vstv %s711_s6 }
   0x2   :  { %15 = vst [vmem:[#allocation2] sm:$0x1] %v14_v0 }
   0x3   :  { %17 = vst [vmem:[#allocation3] sm:$0x1] %v16_v1 }
   0x4   :  { %18 = vsyncpa [#allocation5], 0  ;;  %v413_v2 = vld [vmem:[%s704_s1 + $0x38] sm:$0xff]  ;;  %v412_v3 = vld [vmem:[%s704_s1 + $0x30] sm:$0xff] }
   0x5   :  { %109 = vmatpush.bf16.msra.mxu0 %v413_v2  ;;  %414 = vmatpush.bf16.msra.mxu2 %v413_v2 }
   0x6   :  { %19 = vsyncpa [#allocation7], 0  ;;  %v411_v4 = vld [vmem:[%s704_s1 + $0x28] sm:$0xff]  ;;  %v410_v5 = vld [vmem:[%s704_s1 + $0x20] sm:$0xff]  ;;  %s511_s13 = smov [#allocation6]   ;;  %s354_s16 = sshll.u32 %s710_s8, 4  ;;  %s355_s16 = int_to_ptr.hbm [resolvable:$true] %s354_s16 }
   0x7   :  { %v409_v6 = vld [vmem:[%s704_s1 + $0x18] sm:$0xff]  ;;  %v408_v7 = vld [vmem:[%s704_s1 + $0x10] sm:$0xff]  ;;  %v407_v8 = vld [vmem:[%s704_s1 + $0x8] sm:$0xff]  ;;  %s352_s6 = sshll.u32 %s511_s13, 4  ;;  %s512_s17 = smov [#allocation4]   ;;  %s353_s6 = int_to_ptr.vmem [resolvable:$true] %s352_s6 }
   0x8   :  { %v406_v9 = vld [vmem:[%s704_s1] sm:$0xff]  ;;  %v596_v11 = vld [vmem:[%s703_s0 + $0x8] sm:$0xff]  ;;  %v601_v12 = vld [vmem:[%s703_s0 + $0x10] sm:$0xff]  ;;  %s341_s18 = sshll.u32 %s512_s17, 4  ;;  %s343_s21 = sshll.u32 %s709_s7, 4  ;;  %s342_s18 = int_to_ptr.vmem [resolvable:$true] %s341_s18  ;;  %s344_s21 = int_to_ptr.hbm [resolvable:$true] %s343_s21 }
   0x9   :  { %110 = vmatpush.bf16.msra.mxu0 %v412_v3  ;;  %415 = vmatpush.bf16.msra.mxu2 %v412_v3  ;;  %v591_v10 = vld [vmem:[%s703_s0] sm:$0xff]  ;;  %v606_v13 = vld [vmem:[%s703_s0 + $0x18] sm:$0xff]  ;;  %s509_s0 = smov 96  }
   0xa   :  { %v39_v14 = vpack.c.bf16 %v596_v11, %v591_v10  ;;  %v40_v15 = vpack.c.bf16 %v606_v13, %v601_v12  ;;  %v428_v16 = vld [vmem:[%s705_s2] ss:$0 sm:$0xff] }
   0xd   :  { %111 = vmatpush.bf16.msra.mxu0 %v411_v4  ;;  %416 = vmatpush.bf16.msra.mxu2 %v411_v4 }
  0x11   :  { %112 = vmatpush.bf16.msra.mxu0 %v410_v5  ;;  %417 = vmatpush.bf16.msra.mxu2 %v410_v5 }
  0x15   :  { %113 = vmatpush.bf16.msra.mxu0 %v409_v6  ;;  %418 = vmatpush.bf16.msra.mxu2 %v409_v6 }
  0x19   :  { %114 = vmatpush.bf16.msra.mxu0 %v408_v7  ;;  %419 = vmatpush.bf16.msra.mxu2 %v408_v7 }
  0x1d   :  { %115 = vmatpush.bf16.msra.mxu0 %v407_v8  ;;  %420 = vmatpush.bf16.msra.mxu2 %v407_v8 }
  0x21   :  { %116 = vmatpush.bf16.msra.mxu0 %v406_v9  ;;  %421 = vmatpush.bf16.msra.mxu2 %v406_v9 }
  0x24   :  { %117 = vmatmul.bf16.vlgmr.msra.gmra.mxu0 %v39_v14  ;;  %122 = vmatmul.bf16.vlgmr.msra.gmra.mxu2 %v40_v15 }
  0xa1   :  { %v118_v17 = vpop.f32.mrf.mxu0 }
  0xa2   :  { %v615_v18 = vadd.f32 %v428_v16, %v118_v17 }
  0xa4   :  { %v400_v19 = vmul.f32 -1.442695, %v615_v18 }
  0xa6   :  { %429 = vpow2.f32 %v400_v19  ;;  %v231_v19 = vld [vmem:[#allocation2] sm:$0x1] }
  0xa7   :  { %v123_v20 = vpop.f32.mrf.mxu2 }
  0xa8   :  { %v618_v21 = vadd.f32 %v428_v16, %v123_v20  ;;  %v510_v20 = vmov 0  }
  0xa9   :  { %v120_v22 = vpop.f32.mrf.mxu0  ;;  %426 = vset.pattern.permute.xlu2 %v510_v20  ;;  %427 = vset.pattern.permute.xlu0 %v510_v20 }
  0xaa   :  { %v402_v23 = vmul.f32 -1.442695, %v618_v21  ;;  %v621_v24 = vadd.f32 %v428_v16, %v120_v22  ;;  %234 = vperm.xlu2 %426, %v231_v19  }
  0xac   :  { %v430_v25 = vpop.eup %429  ;;  %431 = vpow2.f32 %v402_v23  ;;  %v401_v26 = vmul.f32 -1.442695, %v621_v24 }
  0xad   :  { %v144_v27 = vadd.f32 1.0, %v430_v25 }
  0xae   :  { %433 = vpow2.f32 %v401_v26 }
  0xaf   :  { %435 = vrcp.f32 %v144_v27  ;;  %v125_v28 = vpop.f32.mrf.mxu2  ;;  %v159_v37 = vand.u32 2147483648, %v144_v27  ;;  %vm153_vm0 = vweird.f32 %v144_v27  ;;  %v157_v39 = vand.u32 2147483647, %v144_v27 }
  0xb0   :  { %v624_v29 = vadd.f32 %v428_v16, %v125_v28 }
  0xb1   :  { %v160_v44 = vor.u32 1.1754944e-38, %v159_v37  ;;  %vm158_vm3 = vcmp.eq.f32.partialorder %v157_v39, 8.507059e+37 }
  0xb2   :  { %v432_v30 = vpop.eup %431  ;;  %v403_v31 = vmul.f32 -1.442695, %v624_v29 }
  0xb3   :  { %v146_v32 = vadd.f32 1.0, %v432_v30 }
  0xb4   :  { %v434_v33 = vpop.eup %433  ;;  %437 = vpow2.f32 %v403_v31 }
  0xb5   :  { %v436_v34 = vpop.eup %435  ;;  %439 = vrcp.f32 %v146_v32  ;;  %v145_v35 = vadd.f32 1.0, %v434_v33  ;;  %v189_v52 = vand.u32 2147483648, %v146_v32  ;;  %v187_v54 = vand.u32 2147483647, %v146_v32 }
  0xb6   :  { %v149_v36 = vmul.f32 %v436_v34, %v144_v27  ;;  %vm154_vm1 = vweird.f32 %v436_v34  ;;  %vm183_vm5 = vweird.f32 %v146_v32 }
  0xb7   :  { %441 = vrcp.f32 %v145_v35  ;;  %vm155_vm2 = vmor %vm153_vm0, %vm154_vm1  ;;  %vm168_vm6 = vweird.f32 %v145_v35  ;;  %v174_v56 = vand.u32 2147483648, %v145_v35  ;;  %v172_v59 = vand.u32 2147483647, %v145_v35 }
  0xb8   :  { %v150_v38 = vsub.f32 1.0, %v149_v36  ;;  %v190_v61 = vor.u32 1.1754944e-38, %v189_v52  ;;  %vm188_vm9 = vcmp.eq.f32.partialorder %v187_v54, 8.507059e+37  ;;  %vm238_vm0 = vcmask 261120   ;;  %v303_v52 = vld [vmem:[%s708_s5 + $0x30] sm:$0xff]  ;;  %v301_v54 = vld [vmem:[%s708_s5 + $0x20] sm:$0xff] }
  0xb9   :  { %v175_v2 = vor.u32 1.1754944e-38, %v174_v56  ;;  %vm173_vm11 = vcmp.eq.f32.partialorder %v172_v59, 8.507059e+37  ;;  %vm261_vm1 = vcmask 253952   ;;  %v300_v56 = vld [vmem:[%s708_s5 + $0x18] sm:$0xff] }
  0xba   :  { %v438_v40 = vpop.eup %437  ;;  %v151_v41 = vmul.f32 %v436_v34, %v150_v38 }
  0xbb   :  { %v440_v42 = vpop.eup %439  ;;  %v147_v43 = vadd.f32 1.0, %v438_v40 }
  0xbc   :  { %v152_v45 = vadd.f32 %v436_v34, %v151_v41  ;;  %v179_v46 = vmul.f32 %v440_v42, %v146_v32  ;;  %vm184_vm4 = vweird.f32 %v440_v42 }
  0xbd   :  { %v442_v47 = vpop.eup %441  ;;  %443 = vrcp.f32 %v147_v43  ;;  %vm185_vm8 = vmor %vm183_vm5, %vm184_vm4  ;;  %v204_v6 = vand.u32 2147483648, %v147_v43  ;;  %v202_v8 = vand.u32 2147483647, %v147_v43  ;;  %vm198_vm13 = vweird.f32 %v147_v43 }
  0xbe   :  { %v156_v48 = vsel %vm155_vm2, %v436_v34, %v152_v45  ;;  %v180_v49 = vsub.f32 1.0, %v179_v46  ;;  %v164_v50 = vmul.f32 %v442_v47, %v145_v35  ;;  %vm169_vm7 = vweird.f32 %v442_v47  ;;  %v310_v45 = vld [vmem:[%s708_s5 + $0x68] sm:$0xff]  ;;  %v309_v46 = vld [vmem:[%s708_s5 + $0x60] sm:$0xff] }
  0xbf   :  { %v161_v51 = vsel %vm158_vm3, %v160_v44, %v156_v48  ;;  %vm170_vm10 = vmor %vm168_vm6, %vm169_vm7  ;;  %v205_v14 = vor.u32 1.1754944e-38, %v204_v6  ;;  %vm203_vm15 = vcmp.eq.f32.partialorder %v202_v8, 8.507059e+37  ;;  %445 = vtanh.f32 %v615_v18  ;;  %v311_v44 = vld [vmem:[%s708_s5 + $0x70] sm:$0xff] }
  0xc0   :  { %212 = vrot.lane.b32.xlu1 %v161_v51, %s509_s0  ;;  %v181_v53 = vmul.f32 %v440_v42, %v180_v49  ;;  %v165_v55 = vsub.f32 1.0, %v164_v50  ;;  %447 = vtanh.f32 %v621_v24  ;;  %v307_v48 = vld [vmem:[%s708_s5 + $0x50] sm:$0xff]  ;;  %v306_v49 = vld [vmem:[%s708_s5 + $0x48] sm:$0xff]  ;;  %v305_v50 = vld [vmem:[%s708_s5 + $0x40] sm:$0xff]  ;;  %vm334_vm2 = vcmask 0  }
  0xc1   :  { %449 = vtanh.f32 %v618_v21  ;;  %v230_v21 = vld [vmem:[%s706_s3] sm:$0x1]  ;;  %v304_v51 = vld [vmem:[%s708_s5 + $0x38] sm:$0xff] }
  0xc2   :  { %v182_v57 = vadd.f32 %v440_v42, %v181_v53  ;;  %v166_v58 = vmul.f32 %v442_v47, %v165_v55  ;;  %451 = vtanh.f32 %v624_v29  ;;  %v302_v53 = vld [vmem:[%s708_s5 + $0x28] sm:$0xff] }
  0xc3   :  { %v444_v60 = vpop.eup %443 }
  0xc4   :  { %v186_v62 = vsel %vm185_vm8, %v440_v42, %v182_v57  ;;  %v167_v63 = vadd.f32 %v442_v47, %v166_v58  ;;  %v194_v0 = vmul.f32 %v444_v60, %v147_v43  ;;  %vm199_vm12 = vweird.f32 %v444_v60  ;;  %v299_v57 = vld [vmem:[%s708_s5 + $0x10] sm:$0xff]  ;;  %v298_v58 = vld [vmem:[%s708_s5 + $0x8] sm:$0xff] }
  0xc5   :  { %v191_v1 = vsel %vm188_vm9, %v190_v61, %v186_v62  ;;  %vm200_vm14 = vmor %vm198_vm13, %vm199_vm12  ;;  %v446_v23 = vpop.eup %445  ;;  %v297_v61 = vld [vmem:[%s708_s5] sm:$0xff] }
  0xc6   :  { %216 = vrot.lane.b32.xlu0 %v191_v1, %s509_s0  ;;  %v171_v3 = vsel %vm170_vm10, %v442_v47, %v167_v63  ;;  %v195_v4 = vsub.f32 1.0, %v194_v0  ;;  %v448_v25 = vpop.eup %447  ;;  %v308_v47 = vld [vmem:[%s708_s5 + $0x58] sm:$0xff]  ;;  %v313_v63 = vld [vmem:[#allocation3] sm:$0x1] }
  0xc7   :  { %v176_v5 = vsel %vm173_vm11, %v175_v2, %v171_v3  ;;  %v450_v31 = vpop.eup %449 }
  0xc8   :  { %214 = vrot.lane.b32.xlu1 %v176_v5, %s509_s0  ;;  %v196_v7 = vmul.f32 %v444_v60, %v195_v4  ;;  %v452_v18 = vpop.eup %451 }
  0xca   :  { %v197_v9 = vadd.f32 %v444_v60, %v196_v7 }
  0xcc   :  { %v201_v15 = vsel %vm200_vm14, %v444_v60, %v197_v9 }
  0xcd   :  { %v206_v16 = vsel %vm203_vm15, %v205_v14, %v201_v15 }
  0xce   :  { %218 = vrot.lane.b32.xlu0 %v206_v16, %s509_s0 }
 0x104   :  { %v235_v29 = vpop.permute.xlu2 %234 }
 0x105   :  { %v237_v37 = vperm.slane %v235_v29, 0 }
 0x132   :  { %v213_v17 = vpop.permute.xlu1 %212 }
 0x133   :  { %v224_v27 = vmul.f32 %v446_v23, %v213_v17 }
 0x138   :  { %v217_v22 = vpop.permute.xlu0 %216 }
 0x139   :  { %v226_v24 = vmul.f32 %v450_v31, %v217_v22 }
 0x13a   :  { %v215_v26 = vpop.permute.xlu1 %214 }
 0x13b   :  { %v225_v28 = vmul.f32 %v448_v25, %v215_v26 }
 0x13d   :  { %v228_v30 = vpack.c.bf16 %v225_v28, %v224_v27 }
 0x13f   :  { %v243_v36 = vsel %vm238_vm0, %v228_v30, 0 }
 0x140   :  { %v219_v32 = vpop.permute.xlu0 %218 }
 0x141   :  { %v227_v33 = vmul.f32 %v452_v18, %v219_v32 }
 0x143   :  { %v229_v34 = vpack.c.bf16 %v227_v33, %v226_v24 }
 0x145   :  { %v246_v35 = vsel %vm238_vm0, %v229_v34, 0 }
 0x146   :  { %254 = vmatpush.bf16.xpose.msra.mxu1 %v246_v35 }
 0x14e   :  { %255 = vmatpush.bf16.xpose.msra.mxu1 %v243_v36 }
 0x155   :  { %404 = vmatmul.msk.bf16.vlgmr.msra.gmra.mxu1 %vm238_vm0, %v230_v21 }
 0x156   :  { %289 = vmatpush.msrb.mxu1 %v606_v13 }
 0x158   :  { %290 = vmatpush.msrb.mxu1 %v601_v12 }
 0x15a   :  { %291 = vmatpush.msrb.mxu1 %v596_v11 }
 0x15c   :  { %292 = vmatpush.msrb.mxu1 %v591_v10  ;;  %v312_v10 = vld [vmem:[%s708_s5 + $0x78] sm:$0xff] }
 0x15d   :  { %314 = vmatpush.msra.mxu3 %v312_v10 }
 0x15f   :  { %315 = vmatpush.msra.mxu3 %v311_v44 }
 0x161   :  { %316 = vmatpush.msra.mxu3 %v310_v45 }
 0x163   :  { %317 = vmatpush.msra.mxu3 %v309_v46 }
 0x165   :  { %318 = vmatpush.msra.mxu3 %v308_v47 }
 0x167   :  { %319 = vmatpush.msra.mxu3 %v307_v48 }
 0x169   :  { %320 = vmatpush.msra.mxu3 %v306_v49 }
 0x16b   :  { %321 = vmatpush.msra.mxu3 %v305_v50 }
 0x16d   :  { %322 = vmatpush.msra.mxu3 %v304_v51 }
 0x16f   :  { %323 = vmatpush.msra.mxu3 %v303_v52 }
 0x171   :  { %324 = vmatpush.msra.mxu3 %v302_v53 }
 0x173   :  { %325 = vmatpush.msra.mxu3 %v301_v54 }
 0x175   :  { %326 = vmatpush.msra.mxu3 %v300_v56 }
 0x177   :  { %327 = vmatpush.msra.mxu3 %v299_v57 }
 0x179   :  { %328 = vmatpush.msra.mxu3 %v298_v58 }
 0x17b   :  { %329 = vmatpush.msra.mxu3 %v297_v61 }
 0x1d2   :  { %v257_v38 = vpop.f32.mrf.mxu1 }
 0x1d3   :  { %v258_v39 = vadd.f32 %v257_v38, %v237_v37 }
 0x1d5   :  { %v262_v40 = vsel %vm261_vm1, %v258_v39, -inf }
 0x1d6   :  { %263 = vmax.xlane.f32.xlu2 %v262_v40 }
 0x1da   :  { %v259_v13 = vpop.f32.mrf.mxu1 }
 0x249   :  { %v264_v12 = vpop.xlane.xlu2 %263 }
 0x24a   :  { %v265_v41 = vsub.f32 %v258_v39, %v264_v12 }
 0x24c   :  { %v266_v42 = vmul.f32 1.442695, %v265_v41 }
 0x24e   :  { %453 = vpow2.f32 %v266_v42 }
 0x254   :  { %v454_v43 = vpop.eup %453 }
 0x255   :  { %v268_v11 = vsel %vm261_vm1, %v454_v43, 0.0 }
 0x256   :  { %269 = vadd.xlane.f32.xlu0 %v268_v11 }
 0x2c9   :  { %v270_v55 = vpop.xlane.xlu0 %269 }
 0x2ca   :  { %455 = vrcp.f32 %v270_v55 }
 0x2d0   :  { %v456_v59 = vpop.eup %455 }
 0x2d1   :  { %v272_v60 = vmul.f32 %v456_v59, %v454_v43 }
 0x2d3   :  { %273 = vst.msk [vmem:[#allocation6] sm:$0x1] %vm261_vm1, %v272_v60  ;;  %405 = vmatmul.msk.f32.vlgmr.msrb.gmra.mxu1 %vm238_vm0, %v272_v60 }
 0x2d4   :  { %357 = dma.vmem_to_hbm [thread:$0]  %s353_s6, 16, %s355_s16, [#allocation7]  }
 0x350   :  { %v294_v62 = vpop.f32.mrf.mxu1 }
 0x351   :  { %330 = vmatmul.f32.vlgmr.msra.gmra.mxu3 %v294_v62 }
 0x3d4   :  { %v331_v0 = vpop.f32.mrf.mxu3 }
 0x3d5   :  { %v332_v1 = vadd.f32 %v331_v0, %v313_v63 }
 0x3d7   :  { %335 = vst.msk [vmem:[#allocation4] sm:$0x1] %vm334_vm2, %v332_v1 }
 0x3d8   :  { %346 = dma.vmem_to_hbm [thread:$0]  %s342_s18, 16, %s344_s21, [#allocation5]  }
 0x3d9   :  { %505 = dma.done.wait [#allocation5], 16  }
 0x3da   :  { %506 = vsyncadd [#allocation5], 4294967280 }
 0x3db   :  { %507 = dma.done.wait [#allocation7], 16  }
 0x3dc   :  { %508 = vsyncadd [#allocation7], 4294967280 }
 0x3dd   :  { %366 = vsyncpa [#allocation5], 1 }
 0x3de   :  { %367 = vsyncpa [#allocation7], 1 }

</bundles_post_ra>
